<compile_context>
chip_gen: v7x
topology: tpu7x:2x2x1
jax: 0.10.0
libtpu: 0.0.40
codegen_flags: <defaults>
</compile_context>

<pallas_src>
import jax
import jax.numpy as jnp
from jax.experimental import pallas as pl
from jax.experimental.pallas import tpu as pltpu

BN_EPS = 1e-5
MIB = 1024 * 1024


def _round_up(x, m):
    return ((x + m - 1) // m) * m


def _pick_tile(n, prefs=(512, 256, 128)):
    for t in prefs:
        if n % t == 0:
            return t
    return 128


def _vmem_capacity_bytes():
    """Physical VMEM per TensorCore; conservative 64 MiB (v7x) fallback."""
    try:
        info = pltpu.get_tpu_info()
        for attr in ("vmem_capacity_bytes", "vmem_bytes", "vmem_size_bytes"):
            cap = getattr(info, attr, None)
            if cap:
                return int(cap)
    except Exception:
        pass
    return 64 * MIB


# ----------------------------- in-kernel helpers ------------------------------

def _cast_adj(a_int8):
    # int8 -> f32 -> bf16; adjacency values are small integer edge counts: exact.
    return a_int8.astype(jnp.float32).astype(jnp.bfloat16)


def _mlp_block(agg_f32, w1_ref, b1_ref, w2_ref, b2_ref):
    """Linear (BatchNorm folded in) -> ReLU -> Linear -> ReLU on one row chunk."""
    h = jnp.maximum(
        jnp.dot(agg_f32.astype(jnp.bfloat16), w1_ref[...],
                preferred_element_type=jnp.float32) + b1_ref[...], 0.0)
    h = jnp.maximum(
        jnp.dot(h.astype(jnp.bfloat16), w2_ref[...],
                preferred_element_type=jnp.float32) + b2_ref[...], 0.0)
    return h.astype(jnp.bfloat16)


def _head_block(g1, g2, stats,
                wl1a_ref, wl1b_ref, wl1c_ref, bl1_ref, wl2_ref, bl2_ref):
    """lin1 over cat(g1, g2, stats) (split-weight sum) -> ReLU -> lin2 -> log_softmax."""
    z = (jnp.dot(g1.astype(jnp.bfloat16), wl1a_ref[...],
                 preferred_element_type=jnp.float32)
         + jnp.dot(g2.astype(jnp.bfloat16), wl1b_ref[...],
                   preferred_element_type=jnp.float32)
         + jnp.dot(stats, wl1c_ref[...], preferred_element_type=jnp.float32)
         + bl1_ref[...])
    z = jnp.maximum(z, 0.0)
    # TODO(synk): F.dropout(p=0.6) is identity in eval mode; training-mode dropout omitted.
    logits = jnp.dot(z.astype(jnp.bfloat16), wl2_ref[...],
                     preferred_element_type=jnp.float32) + bl2_ref[...]
    m = jnp.max(logits, axis=1, keepdims=True)
    return logits - (m + jnp.log(jnp.sum(jnp.exp(logits - m), axis=1, keepdims=True)))


# ------------------------------ Pallas kernels --------------------------------

def _make_resident_kernel(n_pad, row_chunk):
    """A (int8) fully VMEM-resident; both GIN layers + pooling + head in one pass."""
    n_chunks = n_pad // row_chunk

    def kernel(a_ref, x_ref, p_ref, stats_ref,
               w11_ref, b11_ref, w21_ref, b21_ref,
               w12_ref, b12_ref, w22_ref, b22_ref,
               wl1a_ref, wl1b_ref, wl1c_ref, bl1_ref,
               wl2_ref, bl2_ref,
               out_ref,
               h1_buf, h2_buf):
        # conv1: h1[rows] = MLP1(A[rows, :] @ x).  Row-chunked so there is no
        # (n_pad, hpad) f32 accumulator and temporaries are (row_chunk, hpad).
        @pl.loop(0, n_chunks)
        def _conv1(c):
            r0 = pl.multiple_of(c * row_chunk, 128)
            a_rows = _cast_adj(a_ref[pl.ds(r0, row_chunk), :])
            agg = jnp.dot(a_rows, x_ref[...], preferred_element_type=jnp.float32)
            h1_buf[pl.ds(r0, row_chunk), :] = _mlp_block(
                agg, w11_ref, b11_ref, w21_ref, b21_ref)

        # conv2: h2[rows] = MLP2(A[rows, :] @ h1).  A is never re-read from HBM.
        @pl.loop(0, n_chunks)
        def _conv2(c):
            r0 = pl.multiple_of(c * row_chunk, 128)
            a_rows = _cast_adj(a_ref[pl.ds(r0, row_chunk), :])
            agg = jnp.dot(a_rows, h1_buf[...], preferred_element_type=jnp.float32)
            h2_buf[pl.ds(r0, row_chunk), :] = _mlp_block(
                agg, w12_ref, b12_ref, w22_ref, b22_ref)

        # global_add_pool + head (only tiny (num_graphs, hpad) temporaries).
        p = p_ref[...]
        g1 = jnp.dot(p, h1_buf[...], preferred_element_type=jnp.float32)
        g2 = jnp.dot(p, h2_buf[...], preferred_element_type=jnp.float32)
        out_ref[...] = _head_block(g1, g2, stats_ref[...],
                                   wl1a_ref, wl1b_ref, wl1c_ref, bl1_ref,
                                   wl2_ref, bl2_ref)

    return kernel


def _make_streamed_kernel(n_pad, tk, row_chunk):
    """Fallback for graphs whose adjacency does not fit VMEM: stream int8 A tiles.

    grid = (layer, k_tile): layer 0 = conv1, layer 1 = conv2 (+ head at the end).
    """
    n_chunks = n_pad // row_chunk

    def kernel(a_ref, x_ref, p_ref, stats_ref,
               w11_ref, b11_ref, w21_ref, b21_ref,
               w12_ref, b12_ref, w22_ref, b22_ref,
               wl1a_ref, wl1b_ref, wl1c_ref, bl1_ref,
               wl2_ref, bl2_ref,
               out_ref,
               agg_acc, h1_buf, h2_buf):
        layer = pl.program_id(0)
        kt = pl.program_id(1)
        nkt = pl.num_programs(1)
        col0 = pl.multiple_of(kt * tk, 128)       # source-node offset of this A tile

        @pl.when(kt == 0)
        def _zero_acc():
            agg_acc[...] = jnp.zeros_like(agg_acc)

        def accumulate(feat):
            # agg[rows] += A[rows, tile] @ feat[tile]; row-chunked so the int8->bf16
            # cast temporary is (row_chunk, tk), not (n_pad, tk).
            @pl.loop(0, n_chunks)
            def _(c):
                r0 = pl.multiple_of(c * row_chunk, 128)
                a_rows = _cast_adj(a_ref[pl.ds(r0, row_chunk), :])
                agg_acc[pl.ds(r0, row_chunk), :] += jnp.dot(
                    a_rows, feat, preferred_element_type=jnp.float32)

        @pl.when(layer == 0)
        def _agg_conv1():
            accumulate(x_ref[pl.ds(col0, tk), :])

        @pl.when(layer == 1)
        def _agg_conv2():
            accumulate(h1_buf[pl.ds(col0, tk), :])

        # ---- end of the k reduction: run the layer MLP (and the head after conv2)
        @pl.when(kt == nkt - 1)
        def _finish_layer():
            @pl.when(layer == 0)
            def _store_h1():
                @pl.loop(0, n_chunks)
                def _(c):
                    r0 = pl.multiple_of(c * row_chunk, 128)
                    h1_buf[pl.ds(r0, row_chunk), :] = _mlp_block(
                        agg_acc[pl.ds(r0, row_chunk), :],
                        w11_ref, b11_ref, w21_ref, b21_ref)

            @pl.when(layer == 1)
            def _store_h2_and_head():
                @pl.loop(0, n_chunks)
                def _(c):
                    r0 = pl.multiple_of(c * row_chunk, 128)
                    h2_buf[pl.ds(r0, row_chunk), :] = _mlp_block(
                        agg_acc[pl.ds(r0, row_chunk), :],
                        w12_ref, b12_ref, w22_ref, b22_ref)
                p = p_ref[...]
                g1 = jnp.dot(p, h1_buf[...], preferred_element_type=jnp.float32)
                g2 = jnp.dot(p, h2_buf[...], preferred_element_type=jnp.float32)
                out_ref[...] = _head_block(g1, g2, stats_ref[...],
                                           wl1a_ref, wl1b_ref, wl1c_ref, bl1_ref,
                                           wl2_ref, bl2_ref)

    return kernel


# ------------------------------ JAX wrapper ------------------------------------

def gin_g_forward(x, edge_index, batch, eig, stats, params, num_graphs):
    """Full GIN_G forward (eval mode). `eig` is accepted but unused (matches the reference)."""
    del eig
    n, f_in = x.shape
    hpad = params["hpad"]
    n_classes = params["bl2"].shape[1]
    n_pad = _round_up(max(n, 128), 128)

    # Dense adjacency with the GIN self-term folded in: A <- A + (1 + eps) * I, eps = 0.
    # int8 storage: exact for small integer edge counts, half the HBM bytes of bf16.
    adj = jnp.zeros((n_pad, n_pad), jnp.int32)
    adj = adj.at[edge_index[1], edge_index[0]].add(1)
    adj = adj.at[jnp.arange(n), jnp.arange(n)].add(1)
    adj = adj.astype(jnp.int8)

    x_pad = jnp.zeros((n_pad, hpad), jnp.bfloat16).at[:n, :f_in].set(x.astype(jnp.bfloat16))

    # global_add_pool as a 0/1 matrix.  Zero columns for padded nodes mask the
    # (nonzero) padded rows of h1/h2 -- keep this invariant if padding changes.
    pool = (batch[None, :] == jnp.arange(num_graphs)[:, None]).astype(jnp.bfloat16)
    pool = jnp.zeros((num_graphs, n_pad), jnp.bfloat16).at[:, :n].set(pool)

    stats = stats.astype(jnp.float32)

    weight_keys = ("w11", "b11", "w21", "b21", "w12", "b12", "w22", "b22",
                   "wl1a", "wl1b", "wl1c", "bl1", "wl2", "bl2")
    weights = [params[k] for k in weight_keys]
    weight_bytes = sum(int(w.size) * w.dtype.itemsize for w in weights)

    # --------------------- generation-aware VMEM budgeting -----------------------
    cap = _vmem_capacity_bytes()            # 128 MiB on v5e/v6e, 64 MiB on v7x
    budget = int(0.70 * cap)                # headroom for compiler-internal scratch

    common = (n_pad * hpad * 2              # x (bf16, resident)
              + 2 * n_pad * hpad * 2        # h1_buf + h2_buf scratch (bf16)
              + num_graphs * n_pad * 2      # pool matrix
              + weight_bytes + (1 * MIB))   # weights + slack for small operands
    resident_need = n_pad * n_pad + common  # + A fully resident (int8)

    row_chunk = _pick_tile(n_pad)
    vmem = pl.BlockSpec(memory_space=pltpu.MemorySpace.VMEM)
    out_shape = jax.ShapeDtypeStruct((num_graphs, n_classes), jnp.float32)

    if resident_need <= budget:
        # ---- A is DMA'd to VMEM once and reused by both GIN layers.
        vmem_limit = int(min(0.9 * cap, max(1.2 * resident_need, 32 * MIB)))
        call = pl.pallas_call(
            _make_resident_kernel(n_pad, row_chunk),
            out_shape=out_shape,
            grid_spec=pltpu.PrefetchScalarGridSpec(
                num_scalar_prefetch=0,
                grid=(1,),
                in_specs=[vmem] * 18,
                out_specs=pl.BlockSpec((num_graphs, n_classes), lambda i: (0, 0)),
                scratch_shapes=[pltpu.VMEM((n_pad, hpad), jnp.bfloat16),    # h1
                                pltpu.VMEM((n_pad, hpad), jnp.bfloat16)]),  # h2
            compiler_params=pltpu.CompilerParams(
                dimension_semantics=("arbitrary",),
                vmem_limit_bytes=vmem_limit),
        )
    else:
        # ---- Streamed fallback: largest k-tile the VMEM budget allows (tile size
        #      is the biggest pipelining lever); int8 A tiles are double-buffered.
        acc_bytes = n_pad * hpad * 4                          # f32 aggregation accumulator
        tk = 128
        for cand in (512, 256, 128):
            if n_pad % cand == 0 and common + acc_bytes + 2 * n_pad * cand <= budget:
                tk = cand
                break
        streamed_need = common + acc_bytes + 2 * n_pad * tk
        vmem_limit = int(min(0.9 * cap, max(1.2 * streamed_need, 32 * MIB)))
        nkt = n_pad // tk
        call = pl.pallas_call(
            _make_streamed_kernel(n_pad, tk, row_chunk),
            out_shape=out_shape,
            grid_spec=pltpu.PrefetchScalarGridSpec(
                num_scalar_prefetch=0,
                grid=(2, nkt),                                # (layer, k-tile), sequential
                in_specs=[
                    # int8 A column-tiles, double-buffered by the pipeline
                    # (pipeline_mode=pl.Buffered(3) is an option if DMA-latency-exposed).
                    pl.BlockSpec((n_pad, tk), lambda l, t: (0, t)),
                ] + [vmem] * 17,
                out_specs=pl.BlockSpec((num_graphs, n_classes), lambda l, t: (0, 0)),
                scratch_shapes=[pltpu.VMEM((n_pad, hpad), jnp.float32),     # agg accumulator
                                pltpu.VMEM((n_pad, hpad), jnp.bfloat16),    # h1
                                pltpu.VMEM((n_pad, hpad), jnp.bfloat16)]),  # h2
            compiler_params=pltpu.CompilerParams(
                dimension_semantics=("arbitrary", "arbitrary"),
                vmem_limit_bytes=vmem_limit),
        )

    return call(adj, x_pad, pool, stats, *weights)


# ---------------------------- Parameter handling -------------------------------

def make_raw_params(key, num_node_features, dim_h, num_classes=5, num_stats=10):
    """PyTorch-layout-equivalent eval-mode parameters (f32, unpadded)."""
    ks = jax.random.split(key, 10)

    def lin(k, fan_in, fan_out):
        return (0.1 * jax.random.normal(k, (fan_in, fan_out), jnp.float32),
                0.05 * jax.random.normal(jax.random.fold_in(k, 1), (fan_out,), jnp.float32))

    def conv(k1, k2, k3, fan_in, h):
        w1, b1 = lin(k1, fan_in, h)
        w2, b2 = lin(k2, h, h)
        kb = jax.random.split(k3, 4)
        return dict(w1=w1, b1=b1, w2=w2, b2=b2,
                    gamma=1.0 + 0.1 * jax.random.normal(kb[0], (h,), jnp.float32),
                    beta=0.05 * jax.random.normal(kb[1], (h,), jnp.float32),
                    mean=0.05 * jax.random.normal(kb[2], (h,), jnp.float32),
                    var=1.0 + 0.2 * jax.random.uniform(kb[3], (h,), jnp.float32))

    conv1 = conv(ks[0], ks[1], ks[2], num_node_features, dim_h)
    conv2 = conv(ks[3], ks[4], ks[5], dim_h, dim_h)
    wl1, bl1 = lin(ks[6], 2 * dim_h + num_stats, 3 * dim_h)
    wl2, bl2 = lin(ks[7], 3 * dim_h, num_classes)
    return dict(conv1=conv1, conv2=conv2, wl1=wl1, bl1=bl1, wl2=wl2, bl2=bl2,
                dim_h=dim_h, num_node_features=num_node_features,
                num_classes=num_classes, num_stats=num_stats)


def prepare_kernel_params(raw):
    """Fold BatchNorm into W1/b1, split lin1 for the concat trick, pad to 128 lanes, cast to bf16."""
    dim_h = raw["dim_h"]
    f_in = raw["num_node_features"]
    num_stats = raw["num_stats"]
    hpad = _round_up(max(dim_h, f_in), 128)
    head_pad = _round_up(3 * dim_h, 128)

    def pad2(a, r, c):
        return jnp.zeros((r, c), jnp.float32).at[:a.shape[0], :a.shape[1]].set(a)

    def fold_conv(c):
        scale = c["gamma"] * jax.lax.rsqrt(c["var"] + BN_EPS)
        return c["w1"] * scale[None, :], (c["b1"] - c["mean"]) * scale + c["beta"], c["w2"], c["b2"]

    w11, b11, w21, b21 = fold_conv(raw["conv1"])
    w12, b12, w22, b22 = fold_conv(raw["conv2"])
    wl1 = raw["wl1"]

    return dict(
        hpad=hpad,
        w11=pad2(w11, hpad, hpad).astype(jnp.bfloat16), b11=pad2(b11[None, :], 1, hpad),
        w21=pad2(w21, hpad, hpad).astype(jnp.bfloat16), b21=pad2(b21[None, :], 1, hpad),
        w12=pad2(w12, hpad, hpad).astype(jnp.bfloat16), b12=pad2(b12[None, :], 1, hpad),
        w22=pad2(w22, hpad, hpad).astype(jnp.bfloat16), b22=pad2(b22[None, :], 1, hpad),
        wl1a=pad2(wl1[:dim_h], hpad, head_pad).astype(jnp.bfloat16),
        wl1b=pad2(wl1[dim_h:2 * dim_h], hpad, head_pad).astype(jnp.bfloat16),
        wl1c=pad2(wl1[2 * dim_h:], num_stats, head_pad),
        bl1=pad2(raw["bl1"][None, :], 1, head_pad),
        wl2=pad2(raw["wl2"], head_pad, raw["num_classes"]).astype(jnp.bfloat16),
        bl2=raw["bl2"][None, :],
    )


def reference_forward(x, edge_index, batch, eig, stats, raw, num_graphs):
    """Pure-JAX f32 reference of the PyTorch forward (eval mode)."""
    del eig
    n = x.shape[0]
    adj = jnp.zeros((n, n), jnp.float32).at[edge_index[1], edge_index[0]].add(1.0)

    def gin_conv(h, c):
        agg = adj @ h + h
        z = agg @ c["w1"] + c["b1"]
        z = c["gamma"] * (z - c["mean"]) * jax.lax.rsqrt(c["var"] + BN_EPS) + c["beta"]
        z = jnp.maximum(z, 0.0)
        return jnp.maximum(z @ c["w2"] + c["b2"], 0.0)

    h1 = gin_conv(x, raw["conv1"])
    h2 = gin_conv(h1, raw["conv2"])
    pool = (batch[None, :] == jnp.arange(num_graphs)[:, None]).astype(jnp.float32)
    h = jnp.concatenate([pool @ h1, pool @ h2, stats], axis=1)
    h = jnp.maximum(h @ raw["wl1"] + raw["bl1"], 0.0)
    logits = h @ raw["wl2"] + raw["bl2"]
    return jax.nn.log_softmax(logits, axis=1)


# --------------------------------- Main ----------------------------------------

if __name__ == "__main__":
    key = jax.random.PRNGKey(0)

    num_node_features = 4
    dim_h = 32
    num_graphs = 2
    nodes_per_graph = 8
    n_nodes = num_graphs * nodes_per_graph

    # Deterministic example: one undirected ring per graph.
    src, dst = [], []
    for g in range(num_graphs):
        off = g * nodes_per_graph
        for i in range(nodes_per_graph):
            a, b = off + i, off + (i + 1) % nodes_per_graph
            src += [a, b]
            dst += [b, a]
    edge_index = jnp.array([src, dst], dtype=jnp.int32)
    batch = jnp.repeat(jnp.arange(num_graphs, dtype=jnp.int32), nodes_per_graph)

    kx, ke, ks, kp = jax.random.split(key, 4)
    x = jax.random.normal(kx, (n_nodes, num_node_features), jnp.float32)
    eig = jax.random.normal(ke, (n_nodes, 4), jnp.float32)          # unused by forward
    stats = jax.random.normal(ks, (num_graphs, 10), jnp.float32)

    raw = make_raw_params(kp, num_node_features, dim_h)
    params = prepare_kernel_params(raw)

    out = gin_g_forward(x, edge_index, batch, eig, stats, params, num_graphs)
    out = jax.block_until_ready(out)

    assert out.shape == (num_graphs, 5)
    assert bool(jnp.all(jnp.isfinite(out)))
    # log_softmax rows must sum to 1 in prob space
    assert jnp.allclose(jnp.sum(jnp.exp(out), axis=1), 1.0, atol=1e-3)
    # match the f32 reference up to bf16-operand rounding
    ref = reference_forward(x, edge_index, batch, eig, stats, raw, num_graphs)
    assert jnp.allclose(out, ref, atol=1e-1)
    print("KERNEL_OK")
</pallas_src>

<mosaic_0001>
module attributes {stable_mosaic.version = 11 : i64} {
  func.func @kernel(%arg0: i32, %arg1: memref<128x128xi8, #tpu.memory_space<vmem>>, %arg2: memref<128x128xbf16, #tpu.memory_space<vmem>>, %arg3: memref<2x128xbf16, #tpu.memory_space<vmem>>, %arg4: memref<2x10xf32, #tpu.memory_space<vmem>>, %arg5: memref<128x128xbf16, #tpu.memory_space<vmem>>, %arg6: memref<1x128xf32, #tpu.memory_space<vmem>>, %arg7: memref<128x128xbf16, #tpu.memory_space<vmem>>, %arg8: memref<1x128xf32, #tpu.memory_space<vmem>>, %arg9: memref<128x128xbf16, #tpu.memory_space<vmem>>, %arg10: memref<1x128xf32, #tpu.memory_space<vmem>>, %arg11: memref<128x128xbf16, #tpu.memory_space<vmem>>, %arg12: memref<1x128xf32, #tpu.memory_space<vmem>>, %arg13: memref<128x128xbf16, #tpu.memory_space<vmem>>, %arg14: memref<128x128xbf16, #tpu.memory_space<vmem>>, %arg15: memref<10x128xf32, #tpu.memory_space<vmem>>, %arg16: memref<1x128xf32, #tpu.memory_space<vmem>>, %arg17: memref<128x5xbf16, #tpu.memory_space<vmem>>, %arg18: memref<1x5xf32, #tpu.memory_space<vmem>>, %arg19: memref<2x5xf32, #tpu.memory_space<vmem>>, %arg20: memref<128x128xbf16, #tpu.memory_space<vmem>>, %arg21: memref<128x128xbf16, #tpu.memory_space<vmem>>) attributes {dimension_semantics = [#tpu.dimension_semantics<arbitrary>], iteration_bounds = array<i64: 1>, scalar_prefetch = 0 : i64, scratch_operands = 2 : i64, tpu.core_type = #tpu.core_type<tc>, window_params = [{pipeline_mode = #tpu.pipeline_mode<synchronous>, transform_indices = @transform_0, window_bounds = array<i64: 128, 128>}, {pipeline_mode = #tpu.pipeline_mode<synchronous>, transform_indices = @transform_1, window_bounds = array<i64: 128, 128>}, {pipeline_mode = #tpu.pipeline_mode<synchronous>, transform_indices = @transform_2, window_bounds = array<i64: 2, 128>}, {pipeline_mode = #tpu.pipeline_mode<synchronous>, transform_indices = @transform_3, window_bounds = array<i64: 2, 10>}, {pipeline_mode = #tpu.pipeline_mode<synchronous>, transform_indices = @transform_4, window_bounds = array<i64: 128, 128>}, {pipeline_mode = #tpu.pipeline_mode<synchronous>, transform_indices = @transform_5, window_bounds = array<i64: 1, 128>}, {pipeline_mode = #tpu.pipeline_mode<synchronous>, transform_indices = @transform_6, window_bounds = array<i64: 128, 128>}, {pipeline_mode = #tpu.pipeline_mode<synchronous>, transform_indices = @transform_7, window_bounds = array<i64: 1, 128>}, {pipeline_mode = #tpu.pipeline_mode<synchronous>, transform_indices = @transform_8, window_bounds = array<i64: 128, 128>}, {pipeline_mode = #tpu.pipeline_mode<synchronous>, transform_indices = @transform_9, window_bounds = array<i64: 1, 128>}, {pipeline_mode = #tpu.pipeline_mode<synchronous>, transform_indices = @transform_10, window_bounds = array<i64: 128, 128>}, {pipeline_mode = #tpu.pipeline_mode<synchronous>, transform_indices = @transform_11, window_bounds = array<i64: 1, 128>}, {pipeline_mode = #tpu.pipeline_mode<synchronous>, transform_indices = @transform_12, window_bounds = array<i64: 128, 128>}, {pipeline_mode = #tpu.pipeline_mode<synchronous>, transform_indices = @transform_13, window_bounds = array<i64: 128, 128>}, {pipeline_mode = #tpu.pipeline_mode<synchronous>, transform_indices = @transform_14, window_bounds = array<i64: 10, 128>}, {pipeline_mode = #tpu.pipeline_mode<synchronous>, transform_indices = @transform_15, window_bounds = array<i64: 1, 128>}, {pipeline_mode = #tpu.pipeline_mode<synchronous>, transform_indices = @transform_16, window_bounds = array<i64: 128, 5>}, {pipeline_mode = #tpu.pipeline_mode<synchronous>, transform_indices = @transform_17, window_bounds = array<i64: 1, 5>}, {pipeline_mode = #tpu.pipeline_mode<synchronous>, transform_indices = @transform_18, window_bounds = array<i64: 2, 5>}]} {
    %c0_i32 = arith.constant 0 : i32
    %c1_i32 = arith.constant 1 : i32
    %0 = arith.muli %c0_i32, %c1_i32 : i32
    %c0_i32_0 = arith.constant 0 : i32
    %1 = arith.addi %c0_i32_0, %0 : i32
    %c128_i32 = arith.constant 128 : i32
    %2 = arith.muli %1, %c128_i32 : i32
    %3 = tpu.assume_multiple %2, 128 : i32
    %4 = arith.index_cast %3 : i32 to index
    %c0 = arith.constant 0 : index
    %5 = vector.load %arg1[%4, %c0] : memref<128x128xi8, #tpu.memory_space<vmem>>, vector<128x128xi8>
    %6 = arith.sitofp %5 : vector<128x128xi8> to vector<128x128xf32>
    %7 = arith.truncf %6 : vector<128x128xf32> to vector<128x128xbf16>
    %c0_1 = arith.constant 0 : index
    %c0_2 = arith.constant 0 : index
    %8 = vector.load %arg2[%c0_1, %c0_2] : memref<128x128xbf16, #tpu.memory_space<vmem>>, vector<128x128xbf16>
    %cst = arith.constant dense<0.000000e+00> : vector<128x128xf32>
    %9 = tpu.matmul %7, %8, %cst {dimension_numbers = #tpu.dot_dimension_numbers<[1], [0], [0], [1], [0, 0, 1, 1], [], []>} : vector<128x128xbf16>, vector<128x128xbf16>, vector<128x128xf32> -> vector<128x128xf32>
    %10 = arith.truncf %9 : vector<128x128xf32> to vector<128x128xbf16>
    %c0_3 = arith.constant 0 : index
    %c0_4 = arith.constant 0 : index
    %11 = vector.load %arg5[%c0_3, %c0_4] : memref<128x128xbf16, #tpu.memory_space<vmem>>, vector<128x128xbf16>
    %cst_5 = arith.constant dense<0.000000e+00> : vector<128x128xf32>
    %12 = tpu.matmul %10, %11, %cst_5 {dimension_numbers = #tpu.dot_dimension_numbers<[1], [0], [0], [1], [0, 0, 1, 1], [], []>} : vector<128x128xbf16>, vector<128x128xbf16>, vector<128x128xf32> -> vector<128x128xf32>
    %c0_6 = arith.constant 0 : index
    %c0_7 = arith.constant 0 : index
    %13 = vector.load %arg6[%c0_6, %c0_7] : memref<1x128xf32, #tpu.memory_space<vmem>>, vector<1x128xf32>
    %14 = vector.broadcast %13 : vector<1x128xf32> to vector<128x128xf32>
    %15 = arith.addf %12, %14 : vector<128x128xf32>
    %cst_8 = arith.constant 0.000000e+00 : f32
    %16 = vector.broadcast %cst_8 : f32 to vector<128x128xf32>
    %17 = arith.maximumf %15, %16 : vector<128x128xf32>
    %18 = arith.truncf %17 : vector<128x128xf32> to vector<128x128xbf16>
    %c0_9 = arith.constant 0 : index
    %c0_10 = arith.constant 0 : index
    %19 = vector.load %arg7[%c0_9, %c0_10] : memref<128x128xbf16, #tpu.memory_space<vmem>>, vector<128x128xbf16>
    %cst_11 = arith.constant dense<0.000000e+00> : vector<128x128xf32>
    %20 = tpu.matmul %18, %19, %cst_11 {dimension_numbers = #tpu.dot_dimension_numbers<[1], [0], [0], [1], [0, 0, 1, 1], [], []>} : vector<128x128xbf16>, vector<128x128xbf16>, vector<128x128xf32> -> vector<128x128xf32>
    %c0_12 = arith.constant 0 : index
    %c0_13 = arith.constant 0 : index
    %21 = vector.load %arg8[%c0_12, %c0_13] : memref<1x128xf32, #tpu.memory_space<vmem>>, vector<1x128xf32>
    %22 = vector.broadcast %21 : vector<1x128xf32> to vector<128x128xf32>
    %23 = arith.addf %20, %22 : vector<128x128xf32>
    %cst_14 = arith.constant 0.000000e+00 : f32
    %24 = vector.broadcast %cst_14 : f32 to vector<128x128xf32>
    %25 = arith.maximumf %23, %24 : vector<128x128xf32>
    %26 = arith.truncf %25 : vector<128x128xf32> to vector<128x128xbf16>
    %27 = arith.index_cast %3 : i32 to index
    %c0_15 = arith.constant 0 : index
    %28 = vector.load %arg20[%27, %c0_15] : memref<128x128xbf16, #tpu.memory_space<vmem>>, vector<128x128xbf16>
    tpu.vector_store %arg20[%27, %c0_15], %26 {strides = array<i32>} : memref<128x128xbf16, #tpu.memory_space<vmem>>, vector<128x128xbf16>,
    %c1_i32_16 = arith.constant 1 : i32
    %c0_i32_17 = arith.constant 0 : i32
    %c1_i32_18 = arith.constant 1 : i32
    %29 = arith.muli %c0_i32_17, %c1_i32_18 : i32
    %c0_i32_19 = arith.constant 0 : i32
    %30 = arith.addi %c0_i32_19, %29 : i32
    %c128_i32_20 = arith.constant 128 : i32
    %31 = arith.muli %30, %c128_i32_20 : i32
    %32 = tpu.assume_multiple %31, 128 : i32
    %33 = arith.index_cast %32 : i32 to index
    %c0_21 = arith.constant 0 : index
    %34 = vector.load %arg1[%33, %c0_21] : memref<128x128xi8, #tpu.memory_space<vmem>>, vector<128x128xi8>
    %35 = arith.sitofp %34 : vector<128x128xi8> to vector<128x128xf32>
    %36 = arith.truncf %35 : vector<128x128xf32> to vector<128x128xbf16>
    %c0_22 = arith.constant 0 : index
    %c0_23 = arith.constant 0 : index
    %37 = vector.load %arg20[%c0_22, %c0_23] : memref<128x128xbf16, #tpu.memory_space<vmem>>, vector<128x128xbf16>
    %cst_24 = arith.constant dense<0.000000e+00> : vector<128x128xf32>
    %38 = tpu.matmul %36, %37, %cst_24 {dimension_numbers = #tpu.dot_dimension_numbers<[1], [0], [0], [1], [0, 0, 1, 1], [], []>} : vector<128x128xbf16>, vector<128x128xbf16>, vector<128x128xf32> -> vector<128x128xf32>
    %39 = arith.truncf %38 : vector<128x128xf32> to vector<128x128xbf16>
    %c0_25 = arith.constant 0 : index
    %c0_26 = arith.constant 0 : index
    %40 = vector.load %arg9[%c0_25, %c0_26] : memref<128x128xbf16, #tpu.memory_space<vmem>>, vector<128x128xbf16>
    %cst_27 = arith.constant dense<0.000000e+00> : vector<128x128xf32>
    %41 = tpu.matmul %39, %40, %cst_27 {dimension_numbers = #tpu.dot_dimension_numbers<[1], [0], [0], [1], [0, 0, 1, 1], [], []>} : vector<128x128xbf16>, vector<128x128xbf16>, vector<128x128xf32> -> vector<128x128xf32>
    %c0_28 = arith.constant 0 : index
    %c0_29 = arith.constant 0 : index
    %42 = vector.load %arg10[%c0_28, %c0_29] : memref<1x128xf32, #tpu.memory_space<vmem>>, vector<1x128xf32>
    %43 = vector.broadcast %42 : vector<1x128xf32> to vector<128x128xf32>
    %44 = arith.addf %41, %43 : vector<128x128xf32>
    %cst_30 = arith.constant 0.000000e+00 : f32
    %45 = vector.broadcast %cst_30 : f32 to vector<128x128xf32>
    %46 = arith.maximumf %44, %45 : vector<128x128xf32>
    %47 = arith.truncf %46 : vector<128x128xf32> to vector<128x128xbf16>
    %c0_31 = arith.constant 0 : index
    %c0_32 = arith.constant 0 : index
    %48 = vector.load %arg11[%c0_31, %c0_32] : memref<128x128xbf16, #tpu.memory_space<vmem>>, vector<128x128xbf16>
    %cst_33 = arith.constant dense<0.000000e+00> : vector<128x128xf32>
    %49 = tpu.matmul %47, %48, %cst_33 {dimension_numbers = #tpu.dot_dimension_numbers<[1], [0], [0], [1], [0, 0, 1, 1], [], []>} : vector<128x128xbf16>, vector<128x128xbf16>, vector<128x128xf32> -> vector<128x128xf32>
    %c0_34 = arith.constant 0 : index
    %c0_35 = arith.constant 0 : index
    %50 = vector.load %arg12[%c0_34, %c0_35] : memref<1x128xf32, #tpu.memory_space<vmem>>, vector<1x128xf32>
    %51 = vector.broadcast %50 : vector<1x128xf32> to vector<128x128xf32>
    %52 = arith.addf %49, %51 : vector<128x128xf32>
    %cst_36 = arith.constant 0.000000e+00 : f32
    %53 = vector.broadcast %cst_36 : f32 to vector<128x128xf32>
    %54 = arith.maximumf %52, %53 : vector<128x128xf32>
    %55 = arith.truncf %54 : vector<128x128xf32> to vector<128x128xbf16>
    %56 = arith.index_cast %32 : i32 to index
    %c0_37 = arith.constant 0 : index
    %57 = vector.load %arg21[%56, %c0_37] : memref<128x128xbf16, #tpu.memory_space<vmem>>, vector<128x128xbf16>
    tpu.vector_store %arg21[%56, %c0_37], %55 {strides = array<i32>} : memref<128x128xbf16, #tpu.memory_space<vmem>>, vector<128x128xbf16>,
    %c1_i32_38 = arith.constant 1 : i32
    %c0_39 = arith.constant 0 : index
    %c0_40 = arith.constant 0 : index
    %58 = vector.load %arg3[%c0_39, %c0_40] : memref<2x128xbf16, #tpu.memory_space<vmem>>, vector<2x128xbf16>
    %c0_41 = arith.constant 0 : index
    %c0_42 = arith.constant 0 : index
    %59 = vector.load %arg20[%c0_41, %c0_42] : memref<128x128xbf16, #tpu.memory_space<vmem>>, vector<128x128xbf16>
    %cst_43 = arith.constant dense<0.000000e+00> : vector<2x128xf32>
    %60 = tpu.matmul %58, %59, %cst_43 {dimension_numbers = #tpu.dot_dimension_numbers<[1], [0], [0], [1], [0, 0, 1, 1], [], []>} : vector<2x128xbf16>, vector<128x128xbf16>, vector<2x128xf32> -> vector<2x128xf32>
    %c0_44 = arith.constant 0 : index
    %c0_45 = arith.constant 0 : index
    %61 = vector.load %arg21[%c0_44, %c0_45] : memref<128x128xbf16, #tpu.memory_space<vmem>>, vector<128x128xbf16>
    %cst_46 = arith.constant dense<0.000000e+00> : vector<2x128xf32>
    %62 = tpu.matmul %58, %61, %cst_46 {dimension_numbers = #tpu.dot_dimension_numbers<[1], [0], [0], [1], [0, 0, 1, 1], [], []>} : vector<2x128xbf16>, vector<128x128xbf16>, vector<2x128xf32> -> vector<2x128xf32>
    %c0_47 = arith.constant 0 : index
    %c0_48 = arith.constant 0 : index
    %63 = vector.load %arg4[%c0_47, %c0_48] : memref<2x10xf32, #tpu.memory_space<vmem>>, vector<2x10xf32>
    %64 = arith.truncf %60 : vector<2x128xf32> to vector<2x128xbf16>
    %c0_49 = arith.constant 0 : index
    %c0_50 = arith.constant 0 : index
    %65 = vector.load %arg13[%c0_49, %c0_50] : memref<128x128xbf16, #tpu.memory_space<vmem>>, vector<128x128xbf16>
    %cst_51 = arith.constant dense<0.000000e+00> : vector<2x128xf32>
    %66 = tpu.matmul %64, %65, %cst_51 {dimension_numbers = #tpu.dot_dimension_numbers<[1], [0], [0], [1], [0, 0, 1, 1], [], []>} : vector<2x128xbf16>, vector<128x128xbf16>, vector<2x128xf32> -> vector<2x128xf32>
    %67 = arith.truncf %62 : vector<2x128xf32> to vector<2x128xbf16>
    %c0_52 = arith.constant 0 : index
    %c0_53 = arith.constant 0 : index
    %68 = vector.load %arg14[%c0_52, %c0_53] : memref<128x128xbf16, #tpu.memory_space<vmem>>, vector<128x128xbf16>
    %cst_54 = arith.constant dense<0.000000e+00> : vector<2x128xf32>
    %69 = tpu.matmul %67, %68, %cst_54 {dimension_numbers = #tpu.dot_dimension_numbers<[1], [0], [0], [1], [0, 0, 1, 1], [], []>} : vector<2x128xbf16>, vector<128x128xbf16>, vector<2x128xf32> -> vector<2x128xf32>
    %70 = arith.addf %66, %69 : vector<2x128xf32>
    %c0_55 = arith.constant 0 : index
    %c0_56 = arith.constant 0 : index
    %71 = vector.load %arg15[%c0_55, %c0_56] : memref<10x128xf32, #tpu.memory_space<vmem>>, vector<10x128xf32>
    %cst_57 = arith.constant dense<0.000000e+00> : vector<2x128xf32>
    %72 = tpu.matmul %63, %71, %cst_57 {dimension_numbers = #tpu.dot_dimension_numbers<[1], [0], [0], [1], [0, 0, 1, 1], [], []>} : vector<2x10xf32>, vector<10x128xf32>, vector<2x128xf32> -> vector<2x128xf32>
    %73 = arith.addf %70, %72 : vector<2x128xf32>
    %c0_58 = arith.constant 0 : index
    %c0_59 = arith.constant 0 : index
    %74 = vector.load %arg16[%c0_58, %c0_59] : memref<1x128xf32, #tpu.memory_space<vmem>>, vector<1x128xf32>
    %75 = vector.broadcast %74 : vector<1x128xf32> to vector<2x128xf32>
    %76 = arith.addf %73, %75 : vector<2x128xf32>
    %cst_60 = arith.constant 0.000000e+00 : f32
    %77 = vector.broadcast %cst_60 : f32 to vector<2x128xf32>
    %78 = arith.maximumf %76, %77 : vector<2x128xf32>
    %79 = arith.truncf %78 : vector<2x128xf32> to vector<2x128xbf16>
    %c0_61 = arith.constant 0 : index
    %c0_62 = arith.constant 0 : index
    %80 = vector.load %arg17[%c0_61, %c0_62] : memref<128x5xbf16, #tpu.memory_space<vmem>>, vector<128x5xbf16>
    %cst_63 = arith.constant dense<0.000000e+00> : vector<2x5xf32>
    %81 = tpu.matmul %79, %80, %cst_63 {dimension_numbers = #tpu.dot_dimension_numbers<[1], [0], [0], [1], [0, 0, 1, 1], [], []>} : vector<2x128xbf16>, vector<128x5xbf16>, vector<2x5xf32> -> vector<2x5xf32>
    %c0_64 = arith.constant 0 : index
    %c0_65 = arith.constant 0 : index
    %82 = vector.load %arg18[%c0_64, %c0_65] : memref<1x5xf32, #tpu.memory_space<vmem>>, vector<1x5xf32>
    %83 = vector.broadcast %82 : vector<1x5xf32> to vector<2x5xf32>
    %84 = arith.addf %81, %83 : vector<2x5xf32>
    %cst_66 = arith.constant dense<0xFF800000> : vector<2xf32>
    %85 = vector.multi_reduction <maximumf>, %84, %cst_66 [1] : vector<2x5xf32> to vector<2xf32>
    %86 = vector.shape_cast %85 : vector<2xf32> to vector<2x1xf32>
    %87 = vector.broadcast %86 : vector<2x1xf32> to vector<2x5xf32>
    %88 = arith.subf %84, %87 : vector<2x5xf32>
    %89 = math.exp %88 : vector<2x5xf32>
    %cst_67 = arith.constant dense<0.000000e+00> : vector<2xf32>
    %90 = vector.multi_reduction <add>, %89, %cst_67 [1] : vector<2x5xf32> to vector<2xf32>
    %91 = vector.shape_cast %90 : vector<2xf32> to vector<2x1xf32>
    %92 = math.log %91 : vector<2x1xf32>
    %93 = arith.addf %86, %92 : vector<2x1xf32>
    %94 = vector.broadcast %93 : vector<2x1xf32> to vector<2x5xf32>
    %95 = arith.subf %84, %94 : vector<2x5xf32>
    %c0_68 = arith.constant 0 : index
    %c0_69 = arith.constant 0 : index
    %96 = vector.load %arg19[%c0_68, %c0_69] : memref<2x5xf32, #tpu.memory_space<vmem>>, vector<2x5xf32>
    tpu.vector_store %arg19[%c0_68, %c0_69], %95 {strides = array<i32>} : memref<2x5xf32, #tpu.memory_space<vmem>>, vector<2x5xf32>,
    return
  }
  func.func @transform_0(%arg0: i32) -> (i32, i32) {
    %c0_i32 = arith.constant 0 : i32
    %c0_i32_0 = arith.constant 0 : i32
    %c0_i32_1 = arith.constant 0 : i32
    return %c0_i32, %c0_i32_0 : i32, i32
  }
  func.func @transform_1(%arg0: i32) -> (i32, i32) {
    %c0_i32 = arith.constant 0 : i32
    %c0_i32_0 = arith.constant 0 : i32
    %c0_i32_1 = arith.constant 0 : i32
    return %c0_i32, %c0_i32_0 : i32, i32
  }
  func.func @transform_2(%arg0: i32) -> (i32, i32) {
    %c0_i32 = arith.constant 0 : i32
    %c0_i32_0 = arith.constant 0 : i32
    %c0_i32_1 = arith.constant 0 : i32
    return %c0_i32, %c0_i32_0 : i32, i32
  }
  func.func @transform_3(%arg0: i32) -> (i32, i32) {
    %c0_i32 = arith.constant 0 : i32
    %c0_i32_0 = arith.constant 0 : i32
    %c0_i32_1 = arith.constant 0 : i32
    return %c0_i32, %c0_i32_0 : i32, i32
  }
  func.func @transform_4(%arg0: i32) -> (i32, i32) {
    %c0_i32 = arith.constant 0 : i32
    %c0_i32_0 = arith.constant 0 : i32
    %c0_i32_1 = arith.constant 0 : i32
    return %c0_i32, %c0_i32_0 : i32, i32
  }
  func.func @transform_5(%arg0: i32) -> (i32, i32) {
    %c0_i32 = arith.constant 0 : i32
    %c0_i32_0 = arith.constant 0 : i32
    %c0_i32_1 = arith.constant 0 : i32
    return %c0_i32, %c0_i32_0 : i32, i32
  }
  func.func @transform_6(%arg0: i32) -> (i32, i32) {
    %c0_i32 = arith.constant 0 : i32
    %c0_i32_0 = arith.constant 0 : i32
    %c0_i32_1 = arith.constant 0 : i32
    return %c0_i32, %c0_i32_0 : i32, i32
  }
  func.func @transform_7(%arg0: i32) -> (i32, i32) {
    %c0_i32 = arith.constant 0 : i32
    %c0_i32_0 = arith.constant 0 : i32
    %c0_i32_1 = arith.constant 0 : i32
    return %c0_i32, %c0_i32_0 : i32, i32
  }
  func.func @transform_8(%arg0: i32) -> (i32, i32) {
    %c0_i32 = arith.constant 0 : i32
    %c0_i32_0 = arith.constant 0 : i32
    %c0_i32_1 = arith.constant 0 : i32
    return %c0_i32, %c0_i32_0 : i32, i32
  }
  func.func @transform_9(%arg0: i32) -> (i32, i32) {
    %c0_i32 = arith.constant 0 : i32
    %c0_i32_0 = arith.constant 0 : i32
    %c0_i32_1 = arith.constant 0 : i32
    return %c0_i32, %c0_i32_0 : i32, i32
  }
  func.func @transform_10(%arg0: i32) -> (i32, i32) {
    %c0_i32 = arith.constant 0 : i32
    %c0_i32_0 = arith.constant 0 : i32
    %c0_i32_1 = arith.constant 0 : i32
    return %c0_i32, %c0_i32_0 : i32, i32
  }
  func.func @transform_11(%arg0: i32) -> (i32, i32) {
    %c0_i32 = arith.constant 0 : i32
    %c0_i32_0 = arith.constant 0 : i32
    %c0_i32_1 = arith.constant 0 : i32
    return %c0_i32, %c0_i32_0 : i32, i32
  }
  func.func @transform_12(%arg0: i32) -> (i32, i32) {
    %c0_i32 = arith.constant 0 : i32
    %c0_i32_0 = arith.constant 0 : i32
    %c0_i32_1 = arith.constant 0 : i32
    return %c0_i32, %c0_i32_0 : i32, i32
  }
  func.func @transform_13(%arg0: i32) -> (i32, i32) {
    %c0_i32 = arith.constant 0 : i32
    %c0_i32_0 = arith.constant 0 : i32
    %c0_i32_1 = arith.constant 0 : i32
    return %c0_i32, %c0_i32_0 : i32, i32
  }
  func.func @transform_14(%arg0: i32) -> (i32, i32) {
    %c0_i32 = arith.constant 0 : i32
    %c0_i32_0 = arith.constant 0 : i32
    %c0_i32_1 = arith.constant 0 : i32
    return %c0_i32, %c0_i32_0 : i32, i32
  }
  func.func @transform_15(%arg0: i32) -> (i32, i32) {
    %c0_i32 = arith.constant 0 : i32
    %c0_i32_0 = arith.constant 0 : i32
    %c0_i32_1 = arith.constant 0 : i32
    return %c0_i32, %c0_i32_0 : i32, i32
  }
  func.func @transform_16(%arg0: i32) -> (i32, i32) {
    %c0_i32 = arith.constant 0 : i32
    %c0_i32_0 = arith.constant 0 : i32
    %c0_i32_1 = arith.constant 0 : i32
    return %c0_i32, %c0_i32_0 : i32, i32
  }
  func.func @transform_17(%arg0: i32) -> (i32, i32) {
    %c0_i32 = arith.constant 0 : i32
    %c0_i32_0 = arith.constant 0 : i32
    %c0_i32_1 = arith.constant 0 : i32
    return %c0_i32, %c0_i32_0 : i32, i32
  }
  func.func @transform_18(%arg0: i32) -> (i32, i32) {
    %c0_i32 = arith.constant 0 : i32
    %c0_i32_0 = arith.constant 0 : i32
    %c0_i32_1 = arith.constant 0 : i32
    return %c0_i32, %c0_i32_0 : i32, i32
  }
}

</mosaic_0001>

<bundles_post_ra>
// kernel: tpu_custom_call.1
= control target key start
LH: loop header
LB: loop body
LE: loop exit
PB: predicated region body
PF: predicated region fallthrough
CT: control target
= control target key end

     0   :  { %s3131_s0 = inlined_call_operand.hbm [shape: s8[128,128], index: 0, kind: input, shape index: {}]   ;;  %s3132_s1 = inlined_call_operand.vmem [shape: bf16[128,128], index: 1, kind: input, shape index: {}]   ;;  %s3133_s2 = inlined_call_operand.hbm [shape: bf16[2,128], index: 2, kind: input, shape index: {}]   ;;  %s3134_s3 = inlined_call_operand.vmem [shape: f32[2,10], index: 3, kind: input, shape index: {}]   ;;  %s3135_s4 = inlined_call_operand.hbm [shape: bf16[128,128], index: 4, kind: input, shape index: {}]   ;;  %s3136_s5 = inlined_call_operand.hbm [shape: f32[1,128], index: 5, kind: input, shape index: {}]   ;;  %s3137_s6 = inlined_call_operand.hbm [shape: bf16[128,128], index: 6, kind: input, shape index: {}]   ;;  %s3138_s7 = inlined_call_operand.vmem [shape: f32[1,128], index: 7, kind: input, shape index: {}]   ;;  %s3139_s8 = inlined_call_operand.hbm [shape: bf16[128,128], index: 8, kind: input, shape index: {}]   ;;  %s3140_s9 = inlined_call_operand.vmem [shape: f32[1,128], index: 9, kind: input, shape index: {}]   ;;  %s3141_s10 = inlined_call_operand.hbm [shape: bf16[128,128], index: 10, kind: input, shape index: {}]   ;;  %s3142_s11 = inlined_call_operand.vmem [shape: f32[1,128], index: 11, kind: input, shape index: {}]   ;;  %s3143_s12 = inlined_call_operand.hbm [shape: bf16[128,128], index: 12, kind: input, shape index: {}]   ;;  %s3144_s13 = inlined_call_operand.hbm [shape: bf16[128,128], index: 13, kind: input, shape index: {}]   ;;  %s3145_s14 = inlined_call_operand.vmem [shape: f32[10,128], index: 14, kind: input, shape index: {}]   ;;  %s3146_s15 = inlined_call_operand.vmem [shape: f32[1,128], index: 15, kind: input, shape index: {}]   ;;  %s3147_s16 = inlined_call_operand.vmem [shape: bf16[128,5], index: 16, kind: input, shape index: {}]   ;;  %s3148_s17 = inlined_call_operand.vmem [shape: f32[1,5], index: 17, kind: input, shape index: {}]   ;;  %s3149_s18 = inlined_call_operand.hbm [shape: f32[2,5], index: 18, kind: output, shape index: {}]  }
   0x1   :  { %3155 = sst [smem:[#allocation26_spill]] %s3131_s0 }
   0x2   :  { %3156 = sst [smem:[#allocation27_spill]] %s3132_s1 }
   0x3   :  { %3157 = sst [smem:[#allocation28_spill]] %s3133_s2 }
   0x4   :  { %23 = vsyncpa [#allocation5], 0 }
   0x5   :  { %24 = vsyncpa [#allocation8], 0 }
   0x6   :  { %25 = vsyncpa [#allocation11], 0 }
   0x7   :  { %26 = vsyncpa [#allocation14], 0 }
   0x8   :  { %27 = vsyncpa [#allocation17], 0 }
   0x9   :  { %28 = vsyncpa [#allocation6], 0  ;;  %s2654_s27 = smov [#allocation7]   ;;  %s2655_s29 = smov [#allocation10]  }
   0xa   :  { %s49_s28 = sshll.u32 %s2654_s27, 4  ;;  %s73_s30 = sshll.u32 %s2655_s29, 4  ;;  %s50_s28 = int_to_ptr.vmem [resolvable:$true] %s49_s28  ;;  %s74_s30 = int_to_ptr.vmem [resolvable:$true] %s73_s30 }
   0xb   :  { %s3158_s1 = sld [smem:[#allocation28_spill]] }
  0x11   :  { %s2422_s20 = scalar_lea.hbm %s3158_s1, 16 }
  0x12   :  { %p2423_p0 = scmp.ne.s32.totalorder %s3158_s1, %s2422_s20  ;;  %p2426_p1 = scmp.lt.u32.totalorder %s2422_s20, %s3158_s1 }
  0x14   :  { %p2428_p2 = pnand %p2426_p1, %p2423_p0 }
  0x16   :  { %2431 = shalt.err (!%p2428_p2)
}
  0x17   :  { %s2432_s24 = scalar_lea.vmem %s50_s28, 16  ;;  %s2436_s25 = scalar_lea.vmem %s50_s28, 32 }
  0x18   :  { %p2433_p3 = scmp.ne.s32.totalorder %s50_s28, %s2432_s24  ;;  %p2437_p4 = scmp.lt.s32.totalorder %s50_s28, %s50_s28 }
  0x19   :  { %p2438_p5 = scmp.lt.s32.totalorder %s2436_s25, %s2432_s24 }
  0x1b   :  { %p2439_p6 = por %p2438_p5, %p2437_p4 }
  0x1d   :  { %p2440_p7 = pnand %p2439_p6, %p2433_p3 }
  0x1f   :  { %2443 = shalt.err (!%p2440_p7)
}
  0x20   :  { %52 = dma.hbm_to_vmem [thread:$0]  %s3158_s1, 16, %s50_s28, [#allocation8]  }
  0x21   :  { %s2444_s19 = scalar_lea.hbm %s3136_s5, 16 }
  0x22   :  { %p2445_p8 = scmp.ne.s32.totalorder %s3136_s5, %s2444_s19  ;;  %p2448_p9 = scmp.lt.u32.totalorder %s2444_s19, %s3136_s5 }
  0x24   :  { %p2450_p10 = pnand %p2448_p9, %p2445_p8 }
  0x26   :  { %2453 = shalt.err (!%p2450_p10)
}
  0x27   :  { %s2454_s23 = scalar_lea.vmem %s74_s30, 16  ;;  %s2458_s24 = scalar_lea.vmem %s74_s30, 32 }
  0x28   :  { %p2455_p11 = scmp.ne.s32.totalorder %s74_s30, %s2454_s23  ;;  %p2459_p12 = scmp.lt.s32.totalorder %s74_s30, %s74_s30 }
  0x29   :  { %p2460_p13 = scmp.lt.s32.totalorder %s2458_s24, %s2454_s23 }
  0x2b   :  { %p2461_p0 = por %p2460_p13, %p2459_p12 }
  0x2d   :  { %p2462_p1 = pnand %p2461_p0, %p2455_p11 }
  0x2f   :  { %2465 = shalt.err (!%p2462_p1)
}
  0x30   :  { %76 = dma.hbm_to_vmem [thread:$0]  %s3136_s5, 16, %s74_s30, [#allocation11]  }
  0x31   :  { %s2656_s25 = smov [#allocation13]   ;;  %s2657_s27 = smov [#allocation16]  }
  0x32   :  { %s96_s26 = sshll.u32 %s2656_s25, 4  ;;  %s124_s29 = sshll.u32 %s2657_s27, 4  ;;  %s97_s26 = int_to_ptr.vmem [resolvable:$true] %s96_s26  ;;  %s2791_s29 = int_to_ptr.vmem [resolvable:$true] %s124_s29 }
  0x33   :  { %s2466_s21 = scalar_lea.hbm %s3139_s8, 1024 }
  0x34   :  { %p2467_p2 = scmp.ne.s32.totalorder %s3139_s8, %s2466_s21  ;;  %p2470_p3 = scmp.lt.u32.totalorder %s2466_s21, %s3139_s8 }
  0x36   :  { %p2472_p4 = pnand %p2470_p3, %p2467_p2 }
  0x38   :  { %2475 = shalt.err (!%p2472_p4)
}
  0x39   :  { %s2476_s5 = scalar_lea.vmem %s97_s26, 1024  ;;  %p2481_p6 = scmp.lt.s32.totalorder %s97_s26, %s97_s26 }
  0x3a   :  { %p2477_p5 = scmp.ne.s32.totalorder %s97_s26, %s2476_s5  ;;  %p2482_p7 = scmp.lt.s32.totalorder %s2476_s5, %s2476_s5 }
  0x3c   :  { %p2483_p8 = por %p2482_p7, %p2481_p6 }
  0x3e   :  { %p2484_p9 = pnand %p2483_p8, %p2477_p5 }
  0x40   :  { %2487 = shalt.err (!%p2484_p9)
}
  0x41   :  { %s3153_s30 = smov 64   ;;  %s2659_s24 = smov 4  }
  0x42   :  { %102 = dma.hbm_to_vmem [thread:$0]  %s3139_s8, 1024, %s97_s26, [#allocation14], %s3153_s30, %s3153_s30, %s2659_s24  }
  0x43   :  { %s2488_s0 = scalar_lea.hbm %s3143_s12, 1024 }
  0x44   :  { %p2489_p10 = scmp.ne.s32.totalorder %s3143_s12, %s2488_s0  ;;  %p2492_p11 = scmp.lt.u32.totalorder %s2488_s0, %s3143_s12 }
  0x46   :  { %p2494_p12 = pnand %p2492_p11, %p2489_p10 }
  0x48   :  { %2497 = shalt.err (!%p2494_p12)
}
  0x49   :  { %s2498_s2 = scalar_lea.vmem %s2791_s29, 1024  ;;  %p2503_p0 = scmp.lt.s32.totalorder %s2791_s29, %s2791_s29 }
  0x4a   :  { %p2499_p13 = scmp.ne.s32.totalorder %s2791_s29, %s2498_s2  ;;  %p2504_p1 = scmp.lt.s32.totalorder %s2498_s2, %s2498_s2 }
  0x4c   :  { %p2505_p2 = por %p2504_p1, %p2503_p0 }
  0x4e   :  { %p2506_p3 = pnand %p2505_p2, %p2499_p13 }
  0x50   :  { %2509 = shalt.err (!%p2506_p3)
}
  0x51   :  { %130 = dma.hbm_to_vmem [thread:$0]  %s3143_s12, 1024, %s2791_s29, [#allocation17], %s3153_s30, %s3153_s30, %s2659_s24  }
  0x52   :  { %s2660_s23 = smov [#allocation4]   ;;  %s3159_s25 = sld [smem:[#allocation26_spill]] }
  0x53   :  { %s34_s5 = sshll.u32 %s2660_s23, 4  ;;  %s35_s5 = int_to_ptr.vmem [resolvable:$true] %s34_s5 }
  0x58   :  { %s2510_s27 = scalar_lea.hbm %s3159_s25, 512 }
  0x59   :  { %p2511_p4 = scmp.ne.s32.totalorder %s3159_s25, %s2510_s27  ;;  %p2514_p5 = scmp.lt.u32.totalorder %s2510_s27, %s3159_s25 }
  0x5b   :  { %p2516_p6 = pnand %p2514_p5, %p2511_p4 }
  0x5d   :  { %2519 = shalt.err (!%p2516_p6)
}
  0x5e   :  { %s2520_s22 = scalar_lea.vmem %s35_s5, 512  ;;  %p2525_p8 = scmp.lt.s32.totalorder %s35_s5, %s35_s5 }
  0x5f   :  { %p2521_p7 = scmp.ne.s32.totalorder %s35_s5, %s2520_s22  ;;  %p2526_p9 = scmp.lt.s32.totalorder %s2520_s22, %s2520_s22 }
  0x61   :  { %p2527_p10 = por %p2526_p9, %p2525_p8 }
  0x63   :  { %p2528_p11 = pnand %p2527_p10, %p2521_p7 }
  0x65   :  { %2531 = shalt.err (!%p2528_p11)
}
  0x66   :  { %s2661_s12 = smov 128   ;;  %s2662_s29 = smov 8  }
  0x67   :  { %40 = dma.hbm_to_vmem [thread:$0]  %s3159_s25, 512, %s35_s5, [#allocation5], %s2661_s12, %s2661_s12, %s2662_s29  }
  0x68   :  { %s2663_s26 = smov [#allocation9]   ;;  %s2664_s28 = smov [#allocation12]  }
  0x69   :  { %s60_s23 = sshll.u32 %s2663_s26, 4  ;;  %s82_s1 = sshll.u32 %s2664_s28, 4  ;;  %s61_s23 = int_to_ptr.vmem [resolvable:$true] %s60_s23  ;;  %s83_s1 = int_to_ptr.vmem [resolvable:$true] %s82_s1 }
  0x6a   :  { %s2532_s19 = scalar_lea.hbm %s3135_s4, 1024 }
  0x6b   :  { %p2533_p12 = scmp.ne.s32.totalorder %s3135_s4, %s2532_s19  ;;  %p2536_p13 = scmp.lt.u32.totalorder %s2532_s19, %s3135_s4 }
  0x6d   :  { %p2538_p0 = pnand %p2536_p13, %p2533_p12 }
  0x6f   :  { %2541 = shalt.err (!%p2538_p0)
}
  0x70   :  { %s2542_s5 = scalar_lea.vmem %s61_s23, 1024  ;;  %p2547_p2 = scmp.lt.s32.totalorder %s61_s23, %s61_s23 }
  0x71   :  { %p2543_p1 = scmp.ne.s32.totalorder %s61_s23, %s2542_s5  ;;  %p2548_p3 = scmp.lt.s32.totalorder %s2542_s5, %s2542_s5 }
  0x73   :  { %p2549_p4 = por %p2548_p3, %p2547_p2 }
  0x75   :  { %p2550_p5 = pnand %p2549_p4, %p2543_p1 }
  0x77   :  { %2553 = shalt.err (!%p2550_p5)
}
  0x78   :  { %s3160_s25 = smov 64   ;;  %s2554_s8 = scalar_lea.hbm %s3137_s6, 1024 }
  0x79   :  { %66 = dma.hbm_to_vmem [thread:$0]  %s3135_s4, 1024, %s61_s23, [#allocation8], %s3160_s25, %s3160_s25, %s2659_s24  }
  0x7a   :  { %p2555_p6 = scmp.ne.s32.totalorder %s3137_s6, %s2554_s8  ;;  %p2558_p7 = scmp.lt.u32.totalorder %s2554_s8, %s3137_s6 }
  0x7c   :  { %p2560_p8 = pnand %p2558_p7, %p2555_p6 }
  0x7e   :  { %2563 = shalt.err (!%p2560_p8)
}
  0x7f   :  { %s2564_s19 = scalar_lea.vmem %s83_s1, 1024  ;;  %p2569_p10 = scmp.lt.s32.totalorder %s83_s1, %s83_s1 }
  0x80   :  { %p2565_p9 = scmp.ne.s32.totalorder %s83_s1, %s2564_s19  ;;  %p2570_p11 = scmp.lt.s32.totalorder %s2564_s19, %s2564_s19 }
  0x82   :  { %p2571_p12 = por %p2570_p11, %p2569_p10 }
  0x84   :  { %p2572_p13 = pnand %p2571_p12, %p2565_p9 }
  0x86   :  { %2575 = shalt.err (!%p2572_p13)
}
  0x87   :  { %88 = dma.hbm_to_vmem [thread:$0]  %s3137_s6, 1024, %s83_s1, [#allocation11], %s3160_s25, %s3160_s25, %s2659_s24  }
  0x88   :  { %s2665_s21 = smov [#allocation15]   ;;  %s2666_s22 = smov [#allocation18]  }
  0x89   :  { %s110_s20 = sshll.u32 %s2665_s21, 4  ;;  %s136_s5 = sshll.u32 %s2666_s22, 4  ;;  %s111_s20 = int_to_ptr.vmem [resolvable:$true] %s110_s20  ;;  %s137_s5 = int_to_ptr.vmem [resolvable:$true] %s136_s5 }
  0x8a   :  { %s2576_s2 = scalar_lea.hbm %s3141_s10, 1024 }
  0x8b   :  { %p2577_p0 = scmp.ne.s32.totalorder %s3141_s10, %s2576_s2  ;;  %p2580_p1 = scmp.lt.u32.totalorder %s2576_s2, %s3141_s10 }
  0x8d   :  { %p2582_p2 = pnand %p2580_p1, %p2577_p0 }
  0x8f   :  { %2585 = shalt.err (!%p2582_p2)
}
  0x90   :  { %s2586_s6 = scalar_lea.vmem %s111_s20, 1024  ;;  %p2591_p4 = scmp.lt.s32.totalorder %s111_s20, %s111_s20 }
  0x91   :  { %p2587_p3 = scmp.ne.s32.totalorder %s111_s20, %s2586_s6  ;;  %p2592_p5 = scmp.lt.s32.totalorder %s2586_s6, %s2586_s6 }
  0x93   :  { %p2593_p6 = por %p2592_p5, %p2591_p4 }
  0x95   :  { %p2594_p7 = pnand %p2593_p6, %p2587_p3 }
  0x97   :  { %2597 = shalt.err (!%p2594_p7)
}
  0x98   :  { %116 = dma.hbm_to_vmem [thread:$0]  %s3141_s10, 1024, %s111_s20, [#allocation14], %s3160_s25, %s3160_s25, %s2659_s24  }
  0x99   :  { %s2598_s4 = scalar_lea.hbm %s3144_s13, 1024 }
  0x9a   :  { %p2599_p8 = scmp.ne.s32.totalorder %s3144_s13, %s2598_s4  ;;  %p2602_p9 = scmp.lt.u32.totalorder %s2598_s4, %s3144_s13 }
  0x9c   :  { %p2604_p10 = pnand %p2602_p9, %p2599_p8 }
  0x9e   :  { %2607 = shalt.err (!%p2604_p10)
}
  0x9f   :  { %s2608_s29 = scalar_lea.vmem %s137_s5, 1024  ;;  %p2613_p12 = scmp.lt.s32.totalorder %s137_s5, %s137_s5 }
  0xa0   :  { %p2609_p11 = scmp.ne.s32.totalorder %s137_s5, %s2608_s29  ;;  %p2614_p13 = scmp.lt.s32.totalorder %s2608_s29, %s2608_s29 }
  0xa2   :  { %p2615_p0 = por %p2614_p13, %p2613_p12 }
  0xa4   :  { %p2616_p1 = pnand %p2615_p0, %p2609_p11 }
  0xa6   :  { %2619 = shalt.err (!%p2616_p1)
}
  0xa7   :  { %142 = dma.hbm_to_vmem [thread:$0]  %s3144_s13, 1024, %s137_s5, [#allocation17], %s3160_s25, %s3160_s25, %s2659_s24  }
  0xa8   :  { %2642 = dma.done.wait [#allocation5], 512  }
  0xa9   :  { %2643 = vsyncadd [#allocation5], 4294966784 }
  0xaa   :  { %2644 = dma.done.wait [#allocation8], 1040  }
  0xab   :  { %2645 = vsyncadd [#allocation8], 4294966256 }
  0xac   :  { %2646 = dma.done.wait [#allocation11], 1040  }
  0xad   :  { %2647 = vsyncadd [#allocation11], 4294966256 }
  0xae   :  { %2648 = dma.done.wait [#allocation14], 2048  }
  0xaf   :  { %2649 = vsyncadd [#allocation14], 4294965248 }
  0xb0   :  { %2650 = dma.done.wait [#allocation17], 2048  }
  0xb1   :  { %2651 = vsyncadd [#allocation17], 4294965248  ;;  %s3161_s8 = sld [smem:[#allocation27_spill]]  ;;  %v2912_v4 = vld [vmem:[#allocation4] sm:$0xff]  ;;  %v2363_v7 = vld [vmem:[#allocation9 + $0x8] sm:$0xff]   ;;  %vm2668_vm0 = vmmov 0  }
  0xb2   :  { %v183_v5 = vunpack.c.l.s8.bf16 %v2912_v4  ;;  %v2362_v6 = vld [vmem:[#allocation9] sm:$0xff]   ;;  %v2364_v9 = vld [vmem:[#allocation9 + $0x10] sm:$0xff]   ;;  %v2365_v11 = vld [vmem:[#allocation9 + $0x18] sm:$0xff]   ;;  %v184_v18 = vunpack.c.h.s8.bf16 %v2912_v4  ;;  %vm1583_vm1 = vcmask 1041408   ;;  %vm2670_vm2 = vmmov 1  }
  0xb3   :  { %2061 = vmatprep.subr.bf16.mxu1 %v2362_v6  ;;  %v2366_v13 = vld [vmem:[#allocation9 + $0x20] sm:$0xff]   ;;  %v2367_v15 = vld [vmem:[#allocation9 + $0x28] sm:$0xff]   ;;  %v2368_v17 = vld [vmem:[#allocation9 + $0x30] sm:$0xff]   ;;  %vm1579_vm4 = vcmask 80896   ;;  %vm1779_vm5 = vcmask 33792  }
  0xb4   :  { %2045 = vmatprep.mubr.bf16.mxu0 %v183_v5  ;;  %2062 = vmatpush3.bf16.msra.mxu1 %v2362_v6  ;;  %v2929_v16 = vld [vmem:[#allocation4 + $0x8] sm:$0xff]  ;;  %v2935_v20 = vld [vmem:[#allocation4 + $0x10] sm:$0xff]  ;;  %v2943_v23 = vld [vmem:[#allocation4 + $0x18] sm:$0xff] }
  0xb5   :  { %2063 = vmatprep.subr.bf16.mxu1 %v2363_v7  ;;  %v185_v19 = vunpack.c.l.s8.bf16 %v2929_v16  ;;  %v186_v21 = vunpack.c.h.s8.bf16 %v2929_v16  ;;  %v187_v22 = vunpack.c.l.s8.bf16 %v2935_v20  ;;  %v188_v24 = vunpack.c.h.s8.bf16 %v2935_v20  ;;  %v2369_v27 = vld [vmem:[#allocation9 + $0x38] sm:$0xff]   ;;  %v2370_v28 = vld [vmem:[#allocation12] sm:$0xff]   ;;  %v2371_v29 = vld [vmem:[#allocation12 + $0x8] sm:$0xff]  }
  0xb6   :  { %v189_v25 = vunpack.c.l.s8.bf16 %v2943_v23  ;;  %v190_v26 = vunpack.c.h.s8.bf16 %v2943_v23  ;;  %v2372_v30 = vld [vmem:[#allocation12 + $0x10] sm:$0xff]   ;;  %v2373_v31 = vld [vmem:[#allocation12 + $0x18] sm:$0xff]   ;;  %v2374_v32 = vld [vmem:[#allocation12 + $0x20] sm:$0xff]  }
  0xb7   :  { %v2354_v0 = vld [vmem:[%s3161_s8] sm:$0xff]   ;;  %v2355_v1 = vld [vmem:[%s3161_s8 + $0x8] sm:$0xff]   ;;  %v2356_v2 = vld [vmem:[%s3161_s8 + $0x10] sm:$0xff]  }
  0xb8   :  { %2029 = vmatprep.subr.bf16.mxu0 %v2354_v0  ;;  %v2357_v3 = vld [vmem:[%s3161_s8 + $0x18] sm:$0xff]   ;;  %v2358_v8 = vld [vmem:[%s3161_s8 + $0x20] sm:$0xff]   ;;  %v2359_v10 = vld [vmem:[%s3161_s8 + $0x28] sm:$0xff]   ;;  %2064 = vmatpush3.bf16.msra.mxu1 %v2363_v7 }
  0xb9   :  { %2030 = vmatpush3.bf16.msra.mxu0 %v2354_v0  ;;  %v2360_v12 = vld [vmem:[%s3161_s8 + $0x30] sm:$0xff]   ;;  %2065 = vmatprep.subr.bf16.mxu1 %v2364_v9  ;;  %v2361_v14 = vld [vmem:[%s3161_s8 + $0x38] sm:$0xff]   ;;  %v1821_v60 = vld [vmem:[#allocation10] ss:$0 sm:$0xff] }
  0xba   :  { %2031 = vmatprep.subr.bf16.mxu0 %v2355_v1  ;;  %v2375_v33 = vld [vmem:[#allocation12 + $0x28] sm:$0xff]   ;;  %v2376_v58 = vld [vmem:[#allocation12 + $0x30] sm:$0xff]   ;;  %v2377_v59 = vld [vmem:[#allocation12 + $0x38] sm:$0xff]  }
  0xbb   :  { %v2385_v4 = vld [vmem:[#allocation13 + $0x38] sm:$0xff]   ;;  %v2386_v16 = vld [vmem:[#allocation15] sm:$0xff]   ;;  %v2391_v23 = vld [vmem:[#allocation15 + $0x28] sm:$0xff]  }
  0xbc   :  { %2066 = vmatpush3.bf16.msra.mxu1 %v2364_v9  ;;  %v2389_v20 = vld [vmem:[#allocation15 + $0x18] sm:$0xff]   ;;  %vm2330_vm3 = vmpackc.low %vm1583_vm1, %vm2670_vm2 }
  0xbd   :  { %2032 = vmatpush3.bf16.msra.mxu0 %v2355_v1  ;;  %2067 = vmatprep.subr.bf16.mxu1 %v2365_v11 }
  0xbe   :  { %2033 = vmatprep.subr.bf16.mxu0 %v2356_v2 }
  0xc0   :  { %2068 = vmatpush3.bf16.msra.mxu1 %v2365_v11 }
  0xc1   :  { %2034 = vmatpush3.bf16.msra.mxu0 %v2356_v2  ;;  %2069 = vmatprep.subr.bf16.mxu1 %v2366_v13 }
  0xc2   :  { %2035 = vmatprep.subr.bf16.mxu0 %v2357_v3 }
  0xc4   :  { %2070 = vmatpush3.bf16.msra.mxu1 %v2366_v13 }
  0xc5   :  { %2036 = vmatpush3.bf16.msra.mxu0 %v2357_v3  ;;  %2071 = vmatprep.subr.bf16.mxu1 %v2367_v15 }
  0xc6   :  { %2037 = vmatprep.subr.bf16.mxu0 %v2358_v8 }
  0xc8   :  { %2072 = vmatpush3.bf16.msra.mxu1 %v2367_v15 }
  0xc9   :  { %2038 = vmatpush3.bf16.msra.mxu0 %v2358_v8  ;;  %2073 = vmatprep.subr.bf16.mxu1 %v2368_v17 }
  0xca   :  { %2039 = vmatprep.subr.bf16.mxu0 %v2359_v10 }
  0xcc   :  { %2074 = vmatpush3.bf16.msra.mxu1 %v2368_v17 }
  0xcd   :  { %2040 = vmatpush3.bf16.msra.mxu0 %v2359_v10  ;;  %2075 = vmatprep.subr.bf16.mxu1 %v2369_v27 }
  0xce   :  { %2041 = vmatprep.subr.bf16.mxu0 %v2360_v12 }
  0xd0   :  { %2076 = vmatpush3.bf16.msra.mxu1 %v2369_v27 }
  0xd1   :  { %2042 = vmatpush3.bf16.msra.mxu0 %v2360_v12 }
  0xd2   :  { %2043 = vmatprep.subr.bf16.mxu0 %v2361_v14 }
  0xd5   :  { %2044 = vmatpush3.bf16.msra.mxu0 %v2361_v14 }
  0xd6   :  { %2093 = vmatprep.subr.bf16.mxu0 %v2370_v28 }
  0xd8   :  { %2046 = vmatmul.mubr.bf16.vlgmr.msra.gmra.mrb[0].mxu0 %v184_v18 }
  0xd9   :  { %2049 = vmatprep.mubr.bf16.mxu0 %v185_v19  ;;  %2094 = vmatpush3.bf16.msra.mxu0 %v2370_v28 }
  0xda   :  { %2095 = vmatprep.subr.bf16.mxu0 %v2371_v29 }
  0xdd   :  { %2096 = vmatpush3.bf16.msra.mxu0 %v2371_v29 }
  0xde   :  { %2097 = vmatprep.subr.bf16.mxu0 %v2372_v30 }
  0xe0   :  { %2050 = vmatmul.mubr.bf16.gmra.mrb[4].mxu0 %v186_v21 }
  0xe1   :  { %2053 = vmatprep.mubr.bf16.mxu0 %v187_v22  ;;  %2098 = vmatpush3.bf16.msra.mxu0 %v2372_v30 }
  0xe2   :  { %2099 = vmatprep.subr.bf16.mxu0 %v2373_v31 }
  0xe5   :  { %2100 = vmatpush3.bf16.msra.mxu0 %v2373_v31 }
  0xe6   :  { %2101 = vmatprep.subr.bf16.mxu0 %v2374_v32 }
  0xe8   :  { %2054 = vmatmul.mubr.bf16.gmra.mrb[8].mxu0 %v188_v24 }
  0xe9   :  { %2057 = vmatprep.mubr.bf16.mxu0 %v189_v25  ;;  %2102 = vmatpush3.bf16.msra.mxu0 %v2374_v32 }
  0xea   :  { %2103 = vmatprep.subr.bf16.mxu0 %v2375_v33 }
  0xed   :  { %2104 = vmatpush3.bf16.msra.mxu0 %v2375_v33 }
  0xee   :  { %2105 = vmatprep.subr.bf16.mxu0 %v2376_v58 }
  0xf0   :  { %2058 = vmatmul.mubr.bf16.gmra.mrb[12].mxu0 %v190_v26 }
  0xf1   :  { %2106 = vmatpush3.bf16.msra.mxu0 %v2376_v58 }
  0xf2   :  { %2107 = vmatprep.subr.bf16.mxu0 %v2377_v59 }
  0xf5   :  { %2108 = vmatpush3.bf16.msra.mxu0 %v2377_v59 }
 0x1ab   :  { %v2047_v34 = vpop.f32.mrb[0].mxu0 }
 0x1ac   :  { %v289_v35 = vpop.f32.mrb[1].mxu0 }
 0x1ad   :  { %v2048_v36 = vpop.f32.mrb[2].mxu0 }
 0x1ae   :  { %v353_v37 = vpack.c.bf16 %v2048_v36, %v2047_v34  ;;  %v292_v38 = vpop.f32.mrb[3].mxu0 }
 0x1af   :  { %v352_v39 = vpack.c.bf16 %v292_v38, %v289_v35 }
 0x1b1   :  { %2077 = vmatprep.mubr.bf16.mxu1 %v352_v39 }
 0x1b2   :  { %2078 = vmatmul.mubr.bf16.vlgmr.msra.gmra.mrb[0].mxu1 %v353_v37 }
 0x1b3   :  { %v2051_v40 = vpop.f32.mrb[4].mxu0 }
 0x1b4   :  { %v305_v41 = vpop.f32.mrb[5].mxu0 }
 0x1b5   :  { %v2052_v42 = vpop.f32.mrb[6].mxu0 }
 0x1b6   :  { %v355_v43 = vpack.c.bf16 %v2052_v42, %v2051_v40  ;;  %v308_v44 = vpop.f32.mrb[7].mxu0 }
 0x1b7   :  { %v354_v45 = vpack.c.bf16 %v308_v44, %v305_v41 }
 0x1b9   :  { %2081 = vmatprep.mubr.bf16.mxu1 %v354_v45 }
 0x1ba   :  { %2082 = vmatmul.mubr.bf16.gmra.mrb[4].mxu1 %v355_v43 }
 0x1bb   :  { %v2055_v46 = vpop.f32.mrb[8].mxu0 }
 0x1bc   :  { %v321_v47 = vpop.f32.mrb[9].mxu0 }
 0x1bd   :  { %v2056_v48 = vpop.f32.mrb[10].mxu0 }
 0x1be   :  { %v357_v49 = vpack.c.bf16 %v2056_v48, %v2055_v46  ;;  %v324_v50 = vpop.f32.mrb[11].mxu0 }
 0x1bf   :  { %v356_v51 = vpack.c.bf16 %v324_v50, %v321_v47 }
 0x1c1   :  { %2085 = vmatprep.mubr.bf16.mxu1 %v356_v51 }
 0x1c2   :  { %2086 = vmatmul.mubr.bf16.gmra.mrb[8].mxu1 %v357_v49 }
 0x1c3   :  { %v2059_v52 = vpop.f32.mrb[12].mxu0 }
 0x1c4   :  { %v337_v53 = vpop.f32.mrb[13].mxu0 }
 0x1c5   :  { %v2060_v54 = vpop.f32.mrb[14].mxu0 }
 0x1c6   :  { %v359_v55 = vpack.c.bf16 %v2060_v54, %v2059_v52  ;;  %v340_v56 = vpop.f32.mrb[15].mxu0 }
 0x1c7   :  { %v358_v57 = vpack.c.bf16 %v340_v56, %v337_v53 }
 0x1c9   :  { %2089 = vmatprep.mubr.bf16.mxu1 %v358_v57 }
 0x1ca   :  { %2090 = vmatmul.mubr.bf16.gmra.mrb[12].mxu1 %v359_v55 }
 0x1cb   :  { %2141 = vmatprep.mubr.bf16.mxu1 %v183_v5 }
 0x285   :  { %v2079_v61 = vpop.f32.mrb[0].mxu1 }
 0x286   :  { %v474_v62 = vadd.f32 %v2079_v61, %v1821_v60  ;;  %v465_v63 = vpop.f32.mrb[1].mxu1 }
 0x287   :  { %v466_v0 = vadd.f32 %v1821_v60, %v465_v63  ;;  %v2080_v1 = vpop.f32.mrb[2].mxu1 }
 0x288   :  { %v477_v2 = vadd.f32 %v2080_v1, %v1821_v60  ;;  %v468_v3 = vpop.f32.mrb[3].mxu1  ;;  %v530_v7 = vmax.f32 %v474_v62, 0.0  ;;  %v2378_v1 = vld [vmem:[#allocation13] sm:$0xff]  }
 0x289   :  { %v469_v6 = vadd.f32 %v1821_v60, %v468_v3  ;;  %v528_v9 = vmax.f32 %v466_v0, 0.0  ;;  %2157 = vmatprep.subr.bf16.mxu0 %v2378_v1  ;;  %v2380_v3 = vld [vmem:[#allocation13 + $0x10] sm:$0xff]  }
 0x28a   :  { %v531_v8 = vmax.f32 %v477_v2, 0.0  ;;  %v2379_v2 = vld [vmem:[#allocation13 + $0x8] sm:$0xff]  }
 0x28b   :  { %v529_v10 = vmax.f32 %v469_v6, 0.0  ;;  %v2381_v6 = vld [vmem:[#allocation13 + $0x18] sm:$0xff]  }
 0x28c   :  { %v545_v5 = vpack.c.bf16 %v531_v8, %v530_v7  ;;  %v2383_v7 = vld [vmem:[#allocation13 + $0x28] sm:$0xff]   ;;  %v2384_v8 = vld [vmem:[#allocation13 + $0x30] sm:$0xff]  }
 0x28d   :  { %v544_v11 = vpack.c.bf16 %v529_v10, %v528_v9  ;;  %v2083_v12 = vpop.f32.mrb[4].mxu1  ;;  %v1830_v9 = vld [vmem:[%s3138_s7] ss:$0 sm:$0xff] }
 0x28e   :  { %v490_v13 = vadd.f32 %v2083_v12, %v1821_v60  ;;  %v481_v14 = vpop.f32.mrb[5].mxu1 }
 0x28f   :  { %v482_v15 = vadd.f32 %v1821_v60, %v481_v14  ;;  %v2084_v17 = vpop.f32.mrb[6].mxu1  ;;  %2109 = vmatprep.mubr.bf16.mxu0 %v544_v11 }
 0x290   :  { %v493_v27 = vadd.f32 %v2084_v17, %v1821_v60  ;;  %v484_v28 = vpop.f32.mrb[7].mxu1  ;;  %2110 = vmatmul.mubr.bf16.vlgmr.msra.gmra.mrb[16].mxu0 %v545_v5  ;;  %v534_v30 = vmax.f32 %v490_v13, 0.0 }
 0x291   :  { %v485_v29 = vadd.f32 %v1821_v60, %v484_v28  ;;  %v532_v32 = vmax.f32 %v482_v15, 0.0  ;;  %2158 = vmatpush3.bf16.msra.mxu0 %v2378_v1 }
 0x292   :  { %v535_v31 = vmax.f32 %v493_v27, 0.0  ;;  %2159 = vmatprep.subr.bf16.mxu0 %v2379_v2 }
 0x293   :  { %v533_v33 = vmax.f32 %v485_v29, 0.0 }
 0x294   :  { %v547_v34 = vpack.c.bf16 %v535_v31, %v534_v30 }
 0x295   :  { %v546_v35 = vpack.c.bf16 %v533_v33, %v532_v32  ;;  %v2087_v36 = vpop.f32.mrb[8].mxu1  ;;  %2160 = vmatpush3.bf16.msra.mxu0 %v2379_v2 }
 0x296   :  { %v506_v37 = vadd.f32 %v2087_v36, %v1821_v60  ;;  %v497_v38 = vpop.f32.mrb[9].mxu1  ;;  %2161 = vmatprep.subr.bf16.mxu0 %v2380_v3 }
 0x297   :  { %v498_v39 = vadd.f32 %v1821_v60, %v497_v38  ;;  %v2088_v40 = vpop.f32.mrb[10].mxu1  ;;  %2113 = vmatprep.mubr.bf16.mxu0 %v546_v35 }
 0x298   :  { %v509_v41 = vadd.f32 %v2088_v40, %v1821_v60  ;;  %v500_v42 = vpop.f32.mrb[11].mxu1  ;;  %2114 = vmatmul.mubr.bf16.gmra.mrb[20].mxu0 %v547_v34  ;;  %v538_v44 = vmax.f32 %v506_v37, 0.0 }
 0x299   :  { %v501_v43 = vadd.f32 %v1821_v60, %v500_v42  ;;  %v536_v46 = vmax.f32 %v498_v39, 0.0  ;;  %2162 = vmatpush3.bf16.msra.mxu0 %v2380_v3 }
 0x29a   :  { %v539_v45 = vmax.f32 %v509_v41, 0.0  ;;  %2163 = vmatprep.subr.bf16.mxu0 %v2381_v6 }
 0x29b   :  { %v537_v47 = vmax.f32 %v501_v43, 0.0 }
 0x29c   :  { %v549_v48 = vpack.c.bf16 %v539_v45, %v538_v44 }
 0x29d   :  { %v548_v49 = vpack.c.bf16 %v537_v47, %v536_v46  ;;  %v2091_v50 = vpop.f32.mrb[12].mxu1  ;;  %2164 = vmatpush3.bf16.msra.mxu0 %v2381_v6 }
 0x29e   :  { %v522_v51 = vadd.f32 %v2091_v50, %v1821_v60  ;;  %v513_v52 = vpop.f32.mrb[13].mxu1 }
 0x29f   :  { %v514_v53 = vadd.f32 %v1821_v60, %v513_v52  ;;  %v2092_v54 = vpop.f32.mrb[14].mxu1  ;;  %2117 = vmatprep.mubr.bf16.mxu0 %v548_v49 }
 0x2a0   :  { %v525_v55 = vadd.f32 %v2092_v54, %v1821_v60  ;;  %v516_v56 = vpop.f32.mrb[15].mxu1  ;;  %2118 = vmatmul.mubr.bf16.gmra.mrb[24].mxu0 %v549_v48  ;;  %v542_v58 = vmax.f32 %v522_v51, 0.0 }
 0x2a1   :  { %v517_v57 = vadd.f32 %v1821_v60, %v516_v56  ;;  %v540_v61 = vmax.f32 %v514_v53, 0.0  ;;  %v2382_v60 = vld [vmem:[#allocation13 + $0x20] sm:$0xff]  }
 0x2a2   :  { %v543_v59 = vmax.f32 %v525_v55, 0.0  ;;  %2165 = vmatprep.subr.bf16.mxu0 %v2382_v60 }
 0x2a3   :  { %v541_v62 = vmax.f32 %v517_v57, 0.0  ;;  %2166 = vmatpush3.bf16.msra.mxu0 %v2382_v60 }
 0x2a4   :  { %v551_v63 = vpack.c.bf16 %v543_v59, %v542_v58  ;;  %2167 = vmatprep.subr.bf16.mxu0 %v2383_v7 }
 0x2a5   :  { %v550_v0 = vpack.c.bf16 %v541_v62, %v540_v61 }
 0x2a7   :  { %2121 = vmatprep.mubr.bf16.mxu0 %v550_v0  ;;  %2168 = vmatpush3.bf16.msra.mxu0 %v2383_v7 }
 0x2a8   :  { %2122 = vmatmul.mubr.bf16.gmra.mrb[28].mxu0 %v551_v63  ;;  %2169 = vmatprep.subr.bf16.mxu0 %v2384_v8 }
 0x2ab   :  { %2170 = vmatpush3.bf16.msra.mxu0 %v2384_v8 }
 0x2ac   :  { %2171 = vmatprep.subr.bf16.mxu0 %v2385_v4 }
 0x2af   :  { %2172 = vmatpush3.bf16.msra.mxu0 %v2385_v4 }
 0x363   :  { %v2111_v10 = vpop.f32.mrb[16].mxu0 }
 0x364   :  { %v666_v5 = vadd.f32 %v2111_v10, %v1830_v9  ;;  %v657_v11 = vpop.f32.mrb[17].mxu0 }
 0x365   :  { %v658_v12 = vadd.f32 %v1830_v9, %v657_v11  ;;  %v2112_v13 = vpop.f32.mrb[18].mxu0 }
 0x366   :  { %v669_v14 = vadd.f32 %v2112_v13, %v1830_v9  ;;  %v660_v15 = vpop.f32.mrb[19].mxu0  ;;  %v722_v27 = vmax.f32 %v666_v5, 0.0 }
 0x367   :  { %v661_v17 = vadd.f32 %v1830_v9, %v660_v15  ;;  %v720_v29 = vmax.f32 %v658_v12, 0.0 }
 0x368   :  { %v723_v28 = vmax.f32 %v669_v14, 0.0 }
 0x369   :  { %v721_v30 = vmax.f32 %v661_v17, 0.0 }
 0x36a   :  { %v2961_v31 = vpack.c.bf16 %v723_v28, %v722_v27 }
 0x36b   :  { %v2963_v32 = vpack.c.bf16 %v721_v30, %v720_v29  ;;  %v2115_v33 = vpop.f32.mrb[20].mxu0 }
 0x36c   :  { %v682_v34 = vadd.f32 %v2115_v33, %v1830_v9  ;;  %v673_v35 = vpop.f32.mrb[21].mxu0 }
 0x36d   :  { %v674_v36 = vadd.f32 %v1830_v9, %v673_v35  ;;  %v2116_v37 = vpop.f32.mrb[22].mxu0  ;;  %2125 = vmatprep.subr.bf16.mxu1 %v2963_v32 }
 0x36e   :  { %v685_v38 = vadd.f32 %v2116_v37, %v1830_v9  ;;  %v676_v39 = vpop.f32.mrb[23].mxu0  ;;  %2126 = vmatpush3.bf16.msra.mxu1 %v2963_v32  ;;  %v726_v41 = vmax.f32 %v682_v34, 0.0 }
 0x36f   :  { %v677_v40 = vadd.f32 %v1830_v9, %v676_v39  ;;  %2127 = vmatprep.subr.bf16.mxu1 %v2961_v31  ;;  %v724_v43 = vmax.f32 %v674_v36, 0.0 }
 0x370   :  { %v727_v42 = vmax.f32 %v685_v38, 0.0 }
 0x371   :  { %v725_v44 = vmax.f32 %v677_v40, 0.0 }
 0x372   :  { %v2968_v45 = vpack.c.bf16 %v727_v42, %v726_v41  ;;  %2128 = vmatpush3.bf16.msra.mxu1 %v2961_v31 }
 0x373   :  { %v2971_v46 = vpack.c.bf16 %v725_v44, %v724_v43  ;;  %v2119_v47 = vpop.f32.mrb[24].mxu0  ;;  %v2392_v43 = vld [vmem:[#allocation15 + $0x30] sm:$0xff]   ;;  %v2393_v44 = vld [vmem:[#allocation15 + $0x38] sm:$0xff]  }
 0x374   :  { %v698_v48 = vadd.f32 %v2119_v47, %v1830_v9  ;;  %v689_v49 = vpop.f32.mrb[25].mxu0 }
 0x375   :  { %v690_v50 = vadd.f32 %v1830_v9, %v689_v49  ;;  %v2120_v51 = vpop.f32.mrb[26].mxu0  ;;  %2129 = vmatprep.subr.bf16.mxu1 %v2971_v46 }
 0x376   :  { %v701_v52 = vadd.f32 %v2120_v51, %v1830_v9  ;;  %v692_v53 = vpop.f32.mrb[27].mxu0  ;;  %2130 = vmatpush3.bf16.msra.mxu1 %v2971_v46  ;;  %v730_v55 = vmax.f32 %v698_v48, 0.0 }
 0x377   :  { %v693_v54 = vadd.f32 %v1830_v9, %v692_v53  ;;  %2131 = vmatprep.subr.bf16.mxu1 %v2968_v45  ;;  %v728_v57 = vmax.f32 %v690_v50, 0.0 }
 0x378   :  { %v731_v56 = vmax.f32 %v701_v52, 0.0 }
 0x379   :  { %v729_v58 = vmax.f32 %v693_v54, 0.0 }
 0x37a   :  { %v2976_v59 = vpack.c.bf16 %v731_v56, %v730_v55  ;;  %2132 = vmatpush3.bf16.msra.mxu1 %v2968_v45 }
 0x37b   :  { %v2979_v61 = vpack.c.bf16 %v729_v58, %v728_v57  ;;  %v2123_v62 = vpop.f32.mrb[28].mxu0 }
 0x37c   :  { %v714_v63 = vadd.f32 %v2123_v62, %v1830_v9  ;;  %v705_v0 = vpop.f32.mrb[29].mxu0 }
 0x37d   :  { %v706_v1 = vadd.f32 %v1830_v9, %v705_v0  ;;  %v2124_v2 = vpop.f32.mrb[30].mxu0  ;;  %2133 = vmatprep.subr.bf16.mxu1 %v2979_v61 }
 0x37e   :  { %v717_v3 = vadd.f32 %v2124_v2, %v1830_v9  ;;  %v708_v6 = vpop.f32.mrb[31].mxu0  ;;  %2134 = vmatpush3.bf16.msra.mxu1 %v2979_v61  ;;  %v734_v7 = vmax.f32 %v714_v63, 0.0 }
 0x37f   :  { %v709_v60 = vadd.f32 %v1830_v9, %v708_v6  ;;  %2135 = vmatprep.subr.bf16.mxu1 %v2976_v59  ;;  %v732_v10 = vmax.f32 %v706_v1, 0.0 }
 0x380   :  { %v735_v8 = vmax.f32 %v717_v3, 0.0 }
 0x381   :  { %v733_v5 = vmax.f32 %v709_v60, 0.0 }
 0x382   :  { %v2984_v11 = vpack.c.bf16 %v735_v8, %v734_v7  ;;  %2136 = vmatpush3.bf16.msra.mxu1 %v2976_v59 }
 0x383   :  { %v2987_v12 = vpack.c.bf16 %v733_v5, %v732_v10 }
 0x385   :  { %2137 = vmatprep.subr.bf16.mxu1 %v2987_v12 }
 0x386   :  { %2138 = vmatpush3.bf16.msra.mxu1 %v2987_v12 }
 0x387   :  { %2139 = vmatprep.subr.bf16.mxu1 %v2984_v11 }
 0x38a   :  { %2140 = vmatpush3.bf16.msra.mxu1 %v2984_v11 }
 0x38b   :  { %2189 = vmatprep.subr.bf16.mxu1 %v2386_v16 }
 0x38d   :  { %2142 = vmatmul.mubr.bf16.vlgmr.msra.gmra.mrb[16].mxu1 %v184_v18  ;;  %v2667_v18 = vmov 0.0  }
 0x38e   :  { %2145 = vmatprep.mubr.bf16.mxu1 %v185_v19  ;;  %2221 = vmatprep.subr.bf16.mxu0 %v2667_v18  ;;  %v2387_v19 = vld [vmem:[#allocation15 + $0x8] sm:$0xff]  }
 0x38f   :  { %2190 = vmatpush3.bf16.msra.mxu1 %v2386_v16 }
 0x390   :  { %2191 = vmatprep.subr.bf16.mxu1 %v2387_v19 }
 0x393   :  { %2192 = vmatpush3.bf16.msra.mxu1 %v2387_v19 }
 0x395   :  { %2146 = vmatmul.mubr.bf16.gmra.mrb[20].mxu1 %v186_v21  ;;  %v2388_v21 = vld [vmem:[#allocation15 + $0x10] sm:$0xff]  }
 0x396   :  { %2149 = vmatprep.mubr.bf16.mxu1 %v187_v22  ;;  %2193 = vmatprep.subr.bf16.mxu1 %v2388_v21  ;;  %v2390_v22 = vld [vmem:[#allocation15 + $0x20] sm:$0xff]  }
 0x397   :  { %2194 = vmatpush3.bf16.msra.mxu1 %v2388_v21 }
 0x398   :  { %2195 = vmatprep.subr.bf16.mxu1 %v2389_v20 }
 0x39b   :  { %2196 = vmatpush3.bf16.msra.mxu1 %v2389_v20 }
 0x39c   :  { %2197 = vmatprep.subr.bf16.mxu1 %v2390_v22 }
 0x39d   :  { %2150 = vmatmul.mubr.bf16.gmra.mrb[24].mxu1 %v188_v24 }
 0x39e   :  { %2153 = vmatprep.mubr.bf16.mxu1 %v189_v25 }
 0x39f   :  { %2198 = vmatpush3.bf16.msra.mxu1 %v2390_v22 }
 0x3a0   :  { %2199 = vmatprep.subr.bf16.mxu1 %v2391_v23 }
 0x3a3   :  { %2200 = vmatpush3.bf16.msra.mxu1 %v2391_v23 }
 0x3a4   :  { %2201 = vmatprep.subr.bf16.mxu1 %v2392_v43 }
 0x3a5   :  { %2154 = vmatmul.mubr.bf16.gmra.mrb[28].mxu1 %v190_v26 }
 0x3a7   :  { %2202 = vmatpush3.bf16.msra.mxu1 %v2392_v43  ;;  %v2397_v43 = vld [vmem:[#allocation18 + $0x18] sm:$0xff]  }
 0x3a8   :  { %2203 = vmatprep.subr.bf16.mxu1 %v2393_v44 }
 0x3ab   :  { %2204 = vmatpush3.bf16.msra.mxu1 %v2393_v44  ;;  %v2398_v44 = vld [vmem:[#allocation18 + $0x20] sm:$0xff]  }
 0x3ac   :  { %2241 = vmatprep.subr.bf16.mxu1 %v2667_v18 }
 0x460   :  { %v2143_v24 = vpop.f32.mrb[16].mxu1 }
 0x461   :  { %v806_v25 = vpop.f32.mrb[17].mxu1 }
 0x462   :  { %v2144_v26 = vpop.f32.mrb[18].mxu1 }
 0x463   :  { %v870_v9 = vpack.c.bf16 %v2144_v26, %v2143_v24  ;;  %v809_v13 = vpop.f32.mrb[19].mxu1 }
 0x464   :  { %v869_v14 = vpack.c.bf16 %v809_v13, %v806_v25 }
 0x466   :  { %2173 = vmatprep.mubr.bf16.mxu0 %v869_v14 }
 0x467   :  { %2174 = vmatmul.mubr.bf16.vlgmr.msra.gmra.mrb[32].mxu0 %v870_v9 }
 0x468   :  { %2222 = vmatpush3.bf16.msra.mxu0 %v2963_v32  ;;  %v2147_v15 = vpop.f32.mrb[20].mxu1 }
 0x469   :  { %v822_v17 = vpop.f32.mrb[21].mxu1  ;;  %2223 = vmatprep.subr.bf16.mxu0 %v2667_v18 }
 0x46a   :  { %v2148_v27 = vpop.f32.mrb[22].mxu1 }
 0x46b   :  { %v872_v28 = vpack.c.bf16 %v2148_v27, %v2147_v15  ;;  %v825_v29 = vpop.f32.mrb[23].mxu1 }
 0x46c   :  { %v871_v30 = vpack.c.bf16 %v825_v29, %v822_v17  ;;  %2224 = vmatpush3.bf16.msra.mxu0 %v2961_v31 }
 0x46d   :  { %2225 = vmatprep.subr.bf16.mxu0 %v2667_v18 }
 0x46e   :  { %2177 = vmatprep.mubr.bf16.mxu0 %v871_v30 }
 0x46f   :  { %2178 = vmatmul.mubr.bf16.gmra.mrb[36].mxu0 %v872_v28 }
 0x470   :  { %2226 = vmatpush3.bf16.msra.mxu0 %v2971_v46  ;;  %v2151_v33 = vpop.f32.mrb[24].mxu1 }
 0x471   :  { %v838_v34 = vpop.f32.mrb[25].mxu1  ;;  %2227 = vmatprep.subr.bf16.mxu0 %v2667_v18 }
 0x472   :  { %v2152_v32 = vpop.f32.mrb[26].mxu1 }
 0x473   :  { %v874_v35 = vpack.c.bf16 %v2152_v32, %v2151_v33  ;;  %v841_v36 = vpop.f32.mrb[27].mxu1 }
 0x474   :  { %v873_v37 = vpack.c.bf16 %v841_v36, %v838_v34  ;;  %2228 = vmatpush3.bf16.msra.mxu0 %v2968_v45  ;;  %v1839_v45 = vld [vmem:[%s3140_s9] ss:$0 sm:$0xff] }
 0x475   :  { %2229 = vmatprep.subr.bf16.mxu0 %v2667_v18 }
 0x476   :  { %2181 = vmatprep.mubr.bf16.mxu0 %v873_v37 }
 0x477   :  { %2182 = vmatmul.mubr.bf16.gmra.mrb[40].mxu0 %v874_v35 }
 0x478   :  { %2230 = vmatpush3.bf16.msra.mxu0 %v2979_v61  ;;  %v2155_v31 = vpop.f32.mrb[28].mxu1 }
 0x479   :  { %v854_v38 = vpop.f32.mrb[29].mxu1  ;;  %2231 = vmatprep.subr.bf16.mxu0 %v2667_v18 }
 0x47a   :  { %v2156_v39 = vpop.f32.mrb[30].mxu1 }
 0x47b   :  { %v876_v40 = vpack.c.bf16 %v2156_v39, %v2155_v31  ;;  %v857_v41 = vpop.f32.mrb[31].mxu1  ;;  %v3030_v39 = vld [vmem:[#allocation7] sm:$0x1] }
 0x47c   :  { %v875_v42 = vpack.c.bf16 %v857_v41, %v854_v38  ;;  %2232 = vmatpush3.bf16.msra.mxu0 %v2976_v59  ;;  %v2395_v41 = vld [vmem:[#allocation18 + $0x8] sm:$0xff]  }
 0x47d   :  { %2233 = vmatprep.subr.bf16.mxu0 %v2667_v18 }
 0x47e   :  { %2185 = vmatprep.mubr.bf16.mxu0 %v875_v42  ;;  %v2396_v42 = vld [vmem:[#allocation18 + $0x10] sm:$0xff]  }
 0x47f   :  { %2186 = vmatmul.mubr.bf16.gmra.mrb[44].mxu0 %v876_v40  ;;  %v2394_v40 = vld [vmem:[#allocation18] sm:$0xff]  }
 0x480   :  { %2234 = vmatpush3.bf16.msra.mxu0 %v2987_v12  ;;  %2237 = vmatprep.mubr.msk.bf16.mxu0 %vm2668_vm0, %v2667_v18 }
 0x481   :  { %2235 = vmatprep.subr.bf16.mxu0 %v2667_v18 }
 0x484   :  { %2236 = vmatpush3.bf16.msra.mxu0 %v2984_v11 }
 0x485   :  { %2261 = vmatprep.subr.bf16.mxu0 %v2667_v18 }
 0x487   :  { %2238 = vmatmul.mubr.bf16.vlgmr.msra.gmra.mrb[48].mxu0 %v3030_v39 }
 0x488   :  { %2277 = vmatprep.mubr.msk.bf16.mxu0 %vm2668_vm0, %v2667_v18  ;;  %2262 = vmatpush3.bf16.msra.mxu0 %v2394_v40 }
 0x489   :  { %2263 = vmatprep.subr.bf16.mxu0 %v2667_v18 }
 0x48c   :  { %2264 = vmatpush3.bf16.msra.mxu0 %v2395_v41 }
 0x48d   :  { %2265 = vmatprep.subr.bf16.mxu0 %v2667_v18 }
 0x490   :  { %2266 = vmatpush3.bf16.msra.mxu0 %v2396_v42 }
 0x491   :  { %2267 = vmatprep.subr.bf16.mxu0 %v2667_v18 }
 0x494   :  { %2268 = vmatpush3.bf16.msra.mxu0 %v2397_v43  ;;  %v2669_v43 = vmov 0.0|0.0  }
 0x495   :  { %2269 = vmatprep.subr.bf16.mxu0 %v2667_v18 }
 0x498   :  { %2270 = vmatpush3.bf16.msra.mxu0 %v2398_v44  ;;  %v1577_v44 = vld [vmem:[%s3145_s14] sm:$0xff] }
 0x499   :  { %2271 = vmatprep.subr.bf16.mxu0 %v2667_v18 }
 0x53a   :  { %v2175_v46 = vpop.f32.mrb[32].mxu0 }
 0x53b   :  { %v991_v47 = vadd.f32 %v2175_v46, %v1839_v45  ;;  %v982_v48 = vpop.f32.mrb[33].mxu0  ;;  %v2400_v46 = vld [vmem:[#allocation18 + $0x30] sm:$0xff]  }
 0x53c   :  { %v983_v49 = vadd.f32 %v1839_v45, %v982_v48  ;;  %v2176_v50 = vpop.f32.mrb[34].mxu0  ;;  %v1848_v48 = vld [vmem:[%s3142_s11] ss:$0 sm:$0xff] }
 0x53d   :  { %v994_v51 = vadd.f32 %v2176_v50, %v1839_v45  ;;  %v985_v52 = vpop.f32.mrb[35].mxu0  ;;  %v1047_v54 = vmax.f32 %v991_v47, 0.0  ;;  %v2401_v47 = vld [vmem:[#allocation18 + $0x38] sm:$0xff]  }
 0x53e   :  { %v986_v53 = vadd.f32 %v1839_v45, %v985_v52  ;;  %v1045_v56 = vmax.f32 %v983_v49, 0.0 }
 0x53f   :  { %v1048_v55 = vmax.f32 %v994_v51, 0.0 }
 0x540   :  { %v1046_v57 = vmax.f32 %v986_v53, 0.0 }
 0x541   :  { %v1062_v58 = vpack.c.bf16 %v1048_v55, %v1047_v54 }
 0x542   :  { %v1061_v59 = vpack.c.bf16 %v1046_v57, %v1045_v56  ;;  %v2179_v61 = vpop.f32.mrb[36].mxu0 }
 0x543   :  { %v1007_v62 = vadd.f32 %v2179_v61, %v1839_v45  ;;  %v998_v63 = vpop.f32.mrb[37].mxu0 }
 0x544   :  { %v999_v0 = vadd.f32 %v1839_v45, %v998_v63  ;;  %v2180_v1 = vpop.f32.mrb[38].mxu0  ;;  %2205 = vmatprep.mubr.bf16.mxu1 %v1061_v59 }
 0x545   :  { %v1010_v2 = vadd.f32 %v2180_v1, %v1839_v45  ;;  %v1001_v3 = vpop.f32.mrb[39].mxu0  ;;  %2206 = vmatmul.mubr.bf16.vlgmr.msra.gmra.mrb[32].mxu1 %v1062_v58  ;;  %v1051_v60 = vmax.f32 %v1007_v62, 0.0 }
 0x546   :  { %v1002_v6 = vadd.f32 %v1839_v45, %v1001_v3  ;;  %v1049_v8 = vmax.f32 %v999_v0, 0.0 }
 0x547   :  { %v1052_v7 = vmax.f32 %v1010_v2, 0.0 }
 0x548   :  { %v1050_v10 = vmax.f32 %v1002_v6, 0.0 }
 0x549   :  { %v1064_v5 = vpack.c.bf16 %v1052_v7, %v1051_v60 }
 0x54a   :  { %v1063_v11 = vpack.c.bf16 %v1050_v10, %v1049_v8  ;;  %v2183_v12 = vpop.f32.mrb[40].mxu0 }
 0x54b   :  { %v1023_v4 = vadd.f32 %v2183_v12, %v1839_v45  ;;  %v1014_v16 = vpop.f32.mrb[41].mxu0 }
 0x54c   :  { %v1015_v19 = vadd.f32 %v1839_v45, %v1014_v16  ;;  %v2184_v21 = vpop.f32.mrb[42].mxu0  ;;  %2209 = vmatprep.mubr.bf16.mxu1 %v1063_v11 }
 0x54d   :  { %v1026_v20 = vadd.f32 %v2184_v21, %v1839_v45  ;;  %v1017_v22 = vpop.f32.mrb[43].mxu0  ;;  %2210 = vmatmul.mubr.bf16.gmra.mrb[36].mxu1 %v1064_v5  ;;  %v1055_v24 = vmax.f32 %v1023_v4, 0.0 }
 0x54e   :  { %v1018_v23 = vadd.f32 %v1839_v45, %v1017_v22  ;;  %v1053_v26 = vmax.f32 %v1015_v19, 0.0 }
 0x54f   :  { %v1056_v25 = vmax.f32 %v1026_v20, 0.0 }
 0x550   :  { %v1054_v9 = vmax.f32 %v1018_v23, 0.0 }
 0x551   :  { %v1066_v13 = vpack.c.bf16 %v1056_v25, %v1055_v24 }
 0x552   :  { %v1065_v14 = vpack.c.bf16 %v1054_v9, %v1053_v26  ;;  %v2187_v15 = vpop.f32.mrb[44].mxu0 }
 0x553   :  { %v1039_v17 = vadd.f32 %v2187_v15, %v1839_v45  ;;  %v1030_v27 = vpop.f32.mrb[45].mxu0 }
 0x554   :  { %v1031_v28 = vadd.f32 %v1839_v45, %v1030_v27  ;;  %v2188_v29 = vpop.f32.mrb[46].mxu0  ;;  %2213 = vmatprep.mubr.bf16.mxu1 %v1065_v14 }
 0x555   :  { %v1042_v30 = vadd.f32 %v2188_v29, %v1839_v45  ;;  %v1033_v33 = vpop.f32.mrb[47].mxu0  ;;  %2214 = vmatmul.mubr.bf16.gmra.mrb[40].mxu1 %v1066_v13  ;;  %v1059_v32 = vmax.f32 %v1039_v17, 0.0 }
 0x556   :  { %v1034_v34 = vadd.f32 %v1839_v45, %v1033_v33  ;;  %v1057_v36 = vmax.f32 %v1031_v28, 0.0  ;;  %v2399_v45 = vld [vmem:[#allocation18 + $0x28] sm:$0xff]  }
 0x557   :  { %v1060_v35 = vmax.f32 %v1042_v30, 0.0  ;;  %2272 = vmatpush3.bf16.msra.mxu0 %v2399_v45  ;;  %v1578_v45 = vld [vmem:[%s3145_s14 + $0x8] sm:$0x3] }
 0x558   :  { %v1058_v37 = vmax.f32 %v1034_v34, 0.0  ;;  %2273 = vmatprep.subr.bf16.mxu0 %v2667_v18 }
 0x559   :  { %v1068_v31 = vpack.c.bf16 %v1060_v35, %v1059_v32 }
 0x55a   :  { %v1067_v38 = vpack.c.bf16 %v1058_v37, %v1057_v36 }
 0x55b   :  { %2274 = vmatpush3.bf16.msra.mxu0 %v2400_v46  ;;  %v1312_v46 = vpop.f32.mrb[48].mxu0 }
 0x55c   :  { %2217 = vmatprep.mubr.bf16.mxu1 %v1067_v38  ;;  %2275 = vmatprep.subr.bf16.mxu0 %v2667_v18 }
 0x55d   :  { %2218 = vmatmul.mubr.bf16.gmra.mrb[44].mxu1 %v1068_v31 }
 0x55e   :  { %2257 = vmatprep.mubr.msk.bf16.mxu1 %vm2668_vm0, %v2667_v18 }
 0x55f   :  { %2276 = vmatpush3.bf16.msra.mxu0 %v2401_v47  ;;  %v2329_v47 = vpack.c.bf16 %v1578_v45, %v1577_v44 }
 0x560   :  { %2281 = vmatprep.subr.bf16.mxu0 %v2667_v18 }
 0x618   :  { %v2207_v49 = vpop.f32.mrb[32].mxu1 }
 0x619   :  { %v1183_v50 = vadd.f32 %v2207_v49, %v1848_v48  ;;  %v1174_v51 = vpop.f32.mrb[33].mxu1 }
 0x61a   :  { %v1175_v52 = vadd.f32 %v1848_v48, %v1174_v51  ;;  %v2208_v53 = vpop.f32.mrb[34].mxu1  ;;  %v2410_v51 = vld [vmem:[%s3147_s16] sm:$0xff]  }
 0x61b   :  { %v1186_v54 = vadd.f32 %v2208_v53, %v1848_v48  ;;  %v1177_v55 = vpop.f32.mrb[35].mxu1  ;;  %v1239_v57 = vmax.f32 %v1183_v50, 0.0  ;;  %v1366_v50 = vld [vmem:[%s3134_s3] sm:$0x3]  ;;  %v2412_v53 = vld [vmem:[%s3147_s16 + $0x10] sm:$0xff]  }
 0x61c   :  { %v1178_v56 = vadd.f32 %v1848_v48, %v1177_v55  ;;  %v1237_v59 = vmax.f32 %v1175_v52, 0.0  ;;  %v2411_v52 = vld [vmem:[%s3147_s16 + $0x8] sm:$0xff]   ;;  %v2414_v55 = vld [vmem:[%s3147_s16 + $0x20] sm:$0xff]  }
 0x61d   :  { %v1240_v58 = vmax.f32 %v1186_v54, 0.0  ;;  %v2413_v54 = vld [vmem:[%s3147_s16 + $0x18] sm:$0xff]  }
 0x61e   :  { %v1238_v61 = vmax.f32 %v1178_v56, 0.0  ;;  %v2415_v56 = vld [vmem:[%s3147_s16 + $0x28] sm:$0xff]  }
 0x61f   :  { %v1254_v62 = vpack.c.bf16 %v1240_v58, %v1239_v57  ;;  %v2402_v58 = vld [vmem:[#allocation16] sm:$0xff]  }
 0x620   :  { %v1253_v63 = vpack.c.bf16 %v1238_v61, %v1237_v59  ;;  %v2211_v0 = vpop.f32.mrb[36].mxu1 }
 0x621   :  { %v1199_v1 = vadd.f32 %v2211_v0, %v1848_v48  ;;  %v1190_v2 = vpop.f32.mrb[37].mxu1  ;;  %v2403_v0 = vld [vmem:[#allocation16 + $0x8] sm:$0xff]  }
 0x622   :  { %v1191_v3 = vadd.f32 %v1848_v48, %v1190_v2  ;;  %v2212_v6 = vpop.f32.mrb[38].mxu1  ;;  %2242 = vmatpush3.bf16.msra.mxu1 %v1253_v63  ;;  %v2405_v2 = vld [vmem:[#allocation16 + $0x18] sm:$0xff]  }
 0x623   :  { %v1202_v60 = vadd.f32 %v2212_v6, %v1848_v48  ;;  %v1193_v7 = vpop.f32.mrb[39].mxu1  ;;  %2243 = vmatprep.subr.bf16.mxu1 %v2667_v18  ;;  %v1243_v10 = vmax.f32 %v1199_v1, 0.0  ;;  %v2404_v1 = vld [vmem:[#allocation16 + $0x10] sm:$0xff]   ;;  %v2407_v6 = vld [vmem:[#allocation16 + $0x28] sm:$0xff]  }
 0x624   :  { %v1194_v8 = vadd.f32 %v1848_v48, %v1193_v7  ;;  %v1241_v11 = vmax.f32 %v1191_v3, 0.0  ;;  %v2406_v3 = vld [vmem:[#allocation16 + $0x20] sm:$0xff]   ;;  %v2409_v7 = vld [vmem:[#allocation16 + $0x38] sm:$0xff]  }
 0x625   :  { %v1244_v5 = vmax.f32 %v1202_v60, 0.0  ;;  %v2408_v60 = vld [vmem:[#allocation16 + $0x30] sm:$0xff]  }
 0x626   :  { %v1242_v12 = vmax.f32 %v1194_v8, 0.0  ;;  %2244 = vmatpush3.bf16.msra.mxu1 %v1254_v62  ;;  %v1367_v8 = vpack.c.bf16 %v1312_v46, %v1312_v46 }
 0x627   :  { %v1256_v4 = vpack.c.bf16 %v1244_v5, %v1243_v10  ;;  %2245 = vmatprep.subr.bf16.mxu1 %v2667_v18 }
 0x628   :  { %v1255_v16 = vpack.c.bf16 %v1242_v12, %v1241_v11  ;;  %v2215_v19 = vpop.f32.mrb[40].mxu1  ;;  %v2416_v11 = vld [vmem:[%s3147_s16 + $0x30] sm:$0xff]   ;;  %v2417_v12 = vld [vmem:[%s3147_s16 + $0x38] sm:$0xff]  }
 0x629   :  { %v1215_v21 = vadd.f32 %v2215_v19, %v1848_v48  ;;  %v1206_v20 = vpop.f32.mrb[41].mxu1 }
 0x62a   :  { %v1207_v22 = vadd.f32 %v1848_v48, %v1206_v20  ;;  %v2216_v23 = vpop.f32.mrb[42].mxu1  ;;  %2246 = vmatpush3.bf16.msra.mxu1 %v1255_v16  ;;  %v1875_v16 = vld [vmem:[%s3146_s15] ss:$0 sm:$0xff]  ;;  %s2671_s15 = smov [#allocation19]  }
 0x62b   :  { %v1218_v24 = vadd.f32 %v2216_v23, %v1848_v48  ;;  %v1209_v25 = vpop.f32.mrb[43].mxu1  ;;  %2247 = vmatprep.subr.bf16.mxu1 %v2667_v18  ;;  %v1247_v9 = vmax.f32 %v1215_v21, 0.0  ;;  %s1800_s16 = sshll.u32 %s2671_s15, 4  ;;  %s1801_s16 = int_to_ptr.vmem [resolvable:$true] %s1800_s16 }
 0x62c   :  { %v1210_v26 = vadd.f32 %v1848_v48, %v1209_v25  ;;  %v1245_v14 = vmax.f32 %v1207_v22, 0.0  ;;  %p2625_p3 = scmp.lt.s32.totalorder %s1801_s16, %s1801_s16 }
 0x62d   :  { %v1248_v13 = vmax.f32 %v1218_v24, 0.0 }
 0x62e   :  { %v1246_v15 = vmax.f32 %v1210_v26, 0.0  ;;  %2248 = vmatpush3.bf16.msra.mxu1 %v1256_v4 }
 0x62f   :  { %v1258_v17 = vpack.c.bf16 %v1248_v13, %v1247_v9  ;;  %2249 = vmatprep.subr.bf16.mxu1 %v2667_v18 }
 0x630   :  { %v1257_v27 = vpack.c.bf16 %v1246_v15, %v1245_v14  ;;  %v2219_v28 = vpop.f32.mrb[44].mxu1 }
 0x631   :  { %v1231_v29 = vadd.f32 %v2219_v28, %v1848_v48  ;;  %v1222_v30 = vpop.f32.mrb[45].mxu1 }
 0x632   :  { %v1223_v33 = vadd.f32 %v1848_v48, %v1222_v30  ;;  %v2220_v34 = vpop.f32.mrb[46].mxu1  ;;  %2250 = vmatpush3.bf16.msra.mxu1 %v1257_v27 }
 0x633   :  { %v1234_v32 = vadd.f32 %v2220_v34, %v1848_v48  ;;  %v1225_v35 = vpop.f32.mrb[47].mxu1  ;;  %2251 = vmatprep.subr.bf16.mxu1 %v2667_v18  ;;  %v1251_v37 = vmax.f32 %v1231_v29, 0.0 }
 0x634   :  { %v1226_v36 = vadd.f32 %v1848_v48, %v1225_v35  ;;  %v1249_v38 = vmax.f32 %v1223_v33, 0.0  ;;  %v2239_v48 = vpop.f32.mrb[49].mxu0 }
 0x635   :  { %v1252_v31 = vmax.f32 %v1234_v32, 0.0 }
 0x636   :  { %v1250_v40 = vmax.f32 %v1226_v36, 0.0  ;;  %2252 = vmatpush3.bf16.msra.mxu1 %v1258_v17 }
 0x637   :  { %v1260_v41 = vpack.c.bf16 %v1252_v31, %v1251_v37  ;;  %2253 = vmatprep.subr.bf16.mxu1 %v2667_v18 }
 0x638   :  { %v1259_v42 = vpack.c.bf16 %v1250_v40, %v1249_v38 }
 0x63a   :  { %2254 = vmatpush3.bf16.msra.mxu1 %v1259_v42 }
 0x63b   :  { %2255 = vmatprep.subr.bf16.mxu1 %v2667_v18 }
 0x63e   :  { %2256 = vmatpush3.bf16.msra.mxu1 %v1260_v41 }
 0x63f   :  { %2328 = vmatprep.subr.bf16.mxu1 %v2669_v43 }
 0x641   :  { %2258 = vmatmul.mubr.bf16.vlgmr.msra.gmra.mrb[48].mxu1 %v3030_v39  ;;  %v1315_v39 = vpop.f32.mrb[50].mxu0 }
 0x642   :  { %2305 = vmatprep.mubr.msk.f32.mxu1 %vm2668_vm0, %v2667_v18  ;;  %2331 = vmatpush3.bf16.msk.msra.mxu1 %vm2330_vm3, %v2329_v47  ;;  %v2240_v49 = vpop.f32.mrb[51].mxu0 }
 0x643   :  { %2308 = vmatprep.subr.bf16.mxu1 %v2667_v18 }
 0x649   :  { %2306 = vmatmul.mubr.msk.f32.vlgmr.msra.gmra.mrb[52].mxu1 %vm1579_vm4, %v1366_v50 }
 0x64a   :  { %2324 = vmatprep.mubr.msk.bf16.mxu1 %vm2668_vm0, %v2667_v18  ;;  %2309 = vmatpush3.bf16.msra.mxu1 %v2410_v51 }
 0x64b   :  { %2310 = vmatprep.subr.bf16.mxu1 %v2667_v18 }
 0x64e   :  { %2311 = vmatpush3.bf16.msra.mxu1 %v2411_v52 }
 0x64f   :  { %2312 = vmatprep.subr.bf16.mxu1 %v2667_v18 }
 0x652   :  { %2313 = vmatpush3.bf16.msra.mxu1 %v2412_v53 }
 0x653   :  { %2314 = vmatprep.subr.bf16.mxu1 %v2667_v18 }
 0x656   :  { %2315 = vmatpush3.bf16.msra.mxu1 %v2413_v54 }
 0x657   :  { %2316 = vmatprep.subr.bf16.mxu1 %v2667_v18 }
 0x65a   :  { %2317 = vmatpush3.bf16.msra.mxu1 %v2414_v55 }
 0x65b   :  { %2318 = vmatprep.subr.bf16.mxu1 %v2667_v18 }
 0x65e   :  { %2319 = vmatpush3.bf16.msra.mxu1 %v2415_v56 }
 0x65f   :  { %2320 = vmatprep.subr.bf16.mxu1 %v2667_v18 }
 0x662   :  { %2321 = vmatpush3.bf16.msra.mxu1 %v2416_v11 }
 0x663   :  { %2322 = vmatprep.subr.bf16.mxu1 %v2667_v18 }
 0x666   :  { %2323 = vmatpush3.bf16.msra.mxu1 %v2417_v12 }
 0x714   :  { %v1360_v57 = vpop.f32.mrb[48].mxu1 }
 0x715   :  { %v1384_v59 = vpack.c.bf16 %v1360_v57, %v1360_v57  ;;  %v2259_v61 = vpop.f32.mrb[49].mxu1 }
 0x716   :  { %v1363_v62 = vpop.f32.mrb[50].mxu1 }
 0x717   :  { %v2260_v63 = vpop.f32.mrb[51].mxu1  ;;  %2278 = vmatmul.mubr.bf16.vlgmr.msra.gmra.mrb[52].mxu0 %v1384_v59 }
 0x718   :  { %2282 = vmatpush3.bf16.msra.mxu0 %v2402_v58  ;;  %2297 = vmatprep.mubr.msk.bf16.mxu0 %vm2668_vm0, %v2667_v18 }
 0x719   :  { %2283 = vmatprep.subr.bf16.mxu0 %v2667_v18 }
 0x71c   :  { %2284 = vmatpush3.bf16.msra.mxu0 %v2403_v0  ;;  %v1653_v10 = vpop.f32.mrb[52].mxu1 }
 0x71d   :  { %2285 = vmatprep.subr.bf16.mxu0 %v2667_v18  ;;  %v2307_v5 = vpop.f32.mrb[53].mxu1 }
 0x720   :  { %2286 = vmatpush3.bf16.msra.mxu0 %v2404_v1 }
 0x721   :  { %2287 = vmatprep.subr.bf16.mxu0 %v2667_v18 }
 0x724   :  { %2288 = vmatpush3.bf16.msra.mxu0 %v2405_v2 }
 0x725   :  { %2289 = vmatprep.subr.bf16.mxu0 %v2667_v18 }
 0x728   :  { %2290 = vmatpush3.bf16.msra.mxu0 %v2406_v3 }
 0x729   :  { %2291 = vmatprep.subr.bf16.mxu0 %v2667_v18 }
 0x72c   :  { %2292 = vmatpush3.bf16.msra.mxu0 %v2407_v6 }
 0x72d   :  { %2293 = vmatprep.subr.bf16.mxu0 %v2667_v18 }
 0x730   :  { %2294 = vmatpush3.bf16.msra.mxu0 %v2408_v60 }
 0x731   :  { %2295 = vmatprep.subr.bf16.mxu0 %v2667_v18  ;;  %v1876_v18 = vld [vmem:[%s3148_s17] ss:$0 sm:$0xff]  ;;  %s2620_s17 = scalar_lea.vmem %s1801_s16, 32 }
 0x732   :  { %p2621_p2 = scmp.ne.s32.totalorder %s1801_s16, %s2620_s17  ;;  %p2626_p4 = scmp.lt.s32.totalorder %s2620_s17, %s2620_s17 }
 0x734   :  { %2296 = vmatpush3.bf16.msra.mxu0 %v2409_v7  ;;  %p2627_p5 = por %p2626_p4, %p2625_p3 }
 0x736   :  { %p2628_p6 = pnand %p2627_p5, %p2621_p2 }
 0x737   :  { %2298 = vmatmul.mubr.bf16.vlgmr.msra.gmra.mrb[52].mxu0 %v1367_v8 }
 0x80a   :  { %v1571_v4 = vpop.f32.mrb[52].mxu0 }
 0x80b   :  { %v1657_v19 = vadd.f32 %v1653_v10, %v1571_v4  ;;  %v2299_v21 = vpop.f32.mrb[53].mxu0 }
 0x80c   :  { %v1574_v20 = vpop.f32.mrb[54].mxu0 }
 0x80d   :  { %v1665_v22 = vadd.f32 %v1875_v16, %v1657_v19  ;;  %v2300_v23 = vpop.f32.mrb[55].mxu0 }
 0x80f   :  { %v1666_v24 = vmax.f32 %v1665_v22, 0.0 }
 0x811   :  { %v1667_v25 = vpack.c.bf16 %v1666_v24, %v1666_v24 }
 0x813   :  { %2325 = vmatmul.mubr.bf16.vlgmr.msra.gmra.mrb[56].mxu1 %v1667_v25 }
 0x8e6   :  { %v1773_v26 = vpop.f32.mrb[56].mxu1 }
 0x8e7   :  { %v1774_v9 = vadd.f32 %v1876_v18, %v1773_v26  ;;  %v2326_v13 = vpop.f32.mrb[57].mxu1 }
 0x8e8   :  { %v1776_v14 = vpop.f32.mrb[58].mxu1 }
 0x8e9   :  { %v2327_v15 = vpop.f32.mrb[59].mxu1  ;;  %v1780_v17 = vsel %vm1779_vm5, %v1774_v9, -inf }
 0x8ea   :  { %1781 = vmax.xlane.f32.xlu0 %v1780_v17 }
 0x977   :  { %v1782_v27 = vpop.xlane.xlu0 %1781 }
 0x978   :  { %v1783_v28 = vsub.f32 %v1774_v9, %v1782_v27 }
 0x97a   :  { %v1784_v29 = vmul.f32 1.442695, %v1783_v28 }
 0x97c   :  { %2418 = vpow2.f32 %v1784_v29 }
 0x986   :  { %v2419_v30 = vpop.eup %2418 }
 0x987   :  { %v1786_v33 = vsel %vm1779_vm5, %v2419_v30, 0.0 }
 0x988   :  { %1787 = vadd.xlane.f32.xlu0 %v1786_v33 }
 0xa15   :  { %v1788_v34 = vpop.xlane.xlu0 %1787 }
 0xa16   :  { %2420 = vlog2.f32 %v1788_v34 }
 0xa20   :  { %v2421_v32 = vpop.eup %2420 }
 0xa21   :  { %v1790_v35 = vmul.f32 0.6931472, %v2421_v32 }
 0xa23   :  { %v1791_v36 = vadd.f32 %v1790_v35, %v1782_v27 }
 0xa25   :  { %v1792_v37 = vsub.f32 %v1774_v9, %v1791_v36 }
 0xa27   :  { %1793 = vst.msk [vmem:[#allocation19] sm:$0x3] %vm1779_vm5, %v1792_v37 }
 0xa28   :  { %2631 = shalt.err (!%p2628_p6)
}
 0xa29   :  { %s2632_s20 = scalar_lea.hbm %s3149_s18, 32 }
 0xa2a   :  { %p2633_p7 = scmp.ne.s32.totalorder %s3149_s18, %s2632_s20  ;;  %p2636_p8 = scmp.lt.u32.totalorder %s2632_s20, %s3149_s18 }
 0xa2c   :  { %p2638_p9 = pnand %p2636_p8, %p2633_p7 }
 0xa2e   :  { %2641 = shalt.err (!%p2638_p9)
}
 0xa2f   :  { %1803 = dma.vmem_to_hbm [thread:$0]  %s1801_s16, 32, %s3149_s18, [#allocation6]  }
 0xa30   :  { %2652 = dma.done.wait [#allocation6], 32  }
 0xa31   :  { %2653 = vsyncadd [#allocation6], 4294967264 }
 0xa32   :  { %1807 = vsyncpa [#allocation5], 1 }
 0xa33   :  { %1808 = vsyncpa [#allocation8], 1 }
 0xa34   :  { %1809 = vsyncpa [#allocation11], 1 }
 0xa35   :  { %1810 = vsyncpa [#allocation14], 1 }
 0xa36   :  { %1811 = vsyncpa [#allocation17], 1 }
 0xa37   :  { %1812 = vsyncpa [#allocation6], 1 }

</bundles_post_ra>
